<compile_context>
chip_gen: v5e
topology: v5e:2x2
jax: 0.10.0
libtpu: 0.0.40
codegen_flags: <defaults>
</compile_context>

<pallas_src>
import jax
import jax.numpy as jnp
from jax.experimental import pallas as pl
from jax.experimental.pallas import tpu as pltpu


_STRIDE = 9  # nn.Conv2d(..., (2, 1), 9, ...)


# ----------------------------------------------------------------------------
# Fused forward: T -> N -> S -> OutputLayer in one pallas_call
# ----------------------------------------------------------------------------

def stgcn_wave_forward(x_nchw, layer_params, out_params, a_norm, control_str="TNS"):
    assert control_str == "TNS", "fused kernel implements the TNS instantiation"
    (kt_, t_p), (kn_, n_p), (ks_, s_p) = layer_params
    assert (kt_, kn_, ks_) == ("T", "N", "S")

    B, Cin, T_in, n_in = x_nchw.shape
    C = t_p["w"].shape[0]                     # channels after the temporal conv
    dia = 1                                   # 2**0 for the single 'T' layer
    T1 = (T_in - dia - 1) // _STRIDE + 1      # post-conv time steps
    N1 = (n_in - 1) // _STRIDE + 1            # post-conv node count

    # ---- wrapper-side prep (tiny, XLA, mostly parameter-only -> constant folded)
    # Temporal-conv tap gather (strided, KB scale) + tap merge along K axis.
    x = jnp.transpose(x_nchw, (0, 2, 3, 1))                       # (B, T, n, Cin)
    xa = x[:, 0::_STRIDE, ::_STRIDE, :][:, :T1, :N1]
    xb = x[:, dia::_STRIDE, ::_STRIDE, :][:, :T1, :N1]
    assert xa.shape == (B, T1, N1, Cin) and xb.shape == (B, T1, N1, Cin)
    R = B * T1
    M = R * N1
    xcat = jnp.concatenate([xa, xb], axis=-1).reshape(M, 2 * Cin)  # (M, 2*Cin)

    w0 = jnp.transpose(t_p["w"][:, :, 0, 0])                      # (Cin, C)
    w1t = jnp.transpose(t_p["w"][:, :, 1, 0])
    wt = jnp.concatenate([w0, w1t], axis=0)                       # (2*Cin, C)
    bt = t_p["b"].reshape(1, C)

    eye_r = jnp.eye(R, dtype=jnp.float32)
    ones_nn = jnp.ones((N1, N1), jnp.float32)
    gln1 = jnp.kron(eye_r, ones_nn)                               # (M, M) slab-sum
    ln1w = jnp.tile(n_p["w"], (R, 1))                             # (M, C)
    ln1b = jnp.tile(n_p["b"], (R, 1))

    abig = jnp.kron(eye_r, a_norm.astype(jnp.float32))            # (M, M) block-diag A
    ws = s_p["w"]                                                 # (C, C)
    bs = s_p["b"].reshape(1, C)

    Kt = out_params["tconv1_w"].shape[2]
    T_out = T1 - Kt + 1
    assert T_out >= 1
    R2 = B * T_out
    Mout = R2 * N1

    # tconv1 weights per tap: W1[k][ci, co] = w[co, ci, k, 0]
    w1_stack = jnp.transpose(out_params["tconv1_w"][:, :, :, 0], (2, 1, 0))  # (Kt,C,C)
    b1 = out_params["tconv1_b"].reshape(1, C)

    # Row-selection matrices gathering input row (b, to+k, n) for output row (b, to, n)
    b_idx = jnp.arange(B)[:, None, None]
    to_idx = jnp.arange(T_out)[None, :, None]
    n_idx = jnp.arange(N1)[None, None, :]
    gsel = jnp.stack(
        [jax.nn.one_hot(((b_idx * T1 + (to_idx + k)) * N1 + n_idx).reshape(-1),
                        M, dtype=jnp.float32)
         for k in range(Kt)], axis=0)                             # (Kt, Mout, M)

    eye_r2 = jnp.eye(R2, dtype=jnp.float32)
    gln2 = jnp.kron(eye_r2, ones_nn)                              # (Mout, Mout)
    ln2w = jnp.tile(out_params["ln_w"], (R2, 1))                  # (Mout, C)
    ln2b = jnp.tile(out_params["ln_b"], (R2, 1))

    w2 = jnp.transpose(out_params["tconv2_w"][:, :, 0, 0])        # (C, C)
    b2 = out_params["tconv2_b"].reshape(1, C)
    wfc = out_params["fc_w"][:, :, 0, 0]                          # (1, C) row vector
    bfc = out_params["fc_b"].reshape(1, 1)

    inv_nc = 1.0 / float(N1 * C)                                  # LayerNorm([n, c]) count
    f32 = jnp.float32

    # ---- the fused kernel: every layer, all intermediates in VMEM/vregs -------
    def kernel(xcat_ref, wt_ref, bt_ref,
               gln1_ref, ln1w_ref, ln1b_ref,
               abig_ref, ws_ref, bs_ref,
               gsel_ref, w1_ref, b1_ref,
               gln2_ref, ln2w_ref, ln2b_ref,
               w2_ref, b2_ref, wfc_ref, bfc_ref,
               o_ref):

        def group_layer_norm(h, g, w_full, b_full):
            # mean/var over each (n, C) slab: block "ones" matmul + lane reduce
            mean = jnp.sum(jnp.dot(g, h, preferred_element_type=f32),
                           axis=-1, keepdims=True) * inv_nc
            d = h - mean
            var = jnp.sum(jnp.dot(g, d * d, preferred_element_type=f32),
                          axis=-1, keepdims=True) * inv_nc
            return d * jax.lax.rsqrt(var + 1e-5) * w_full + b_full

        # T: temporal conv (2,1), stride 9 -> merged-tap (M, 2Cin)@(2Cin, C) + relu
        h = jnp.dot(xcat_ref[...], wt_ref[...], preferred_element_type=f32)
        h = jnp.maximum(h + bt_ref[...], 0.0)                     # (M, C)

        # N: LayerNorm([n, c]) per (b, t) slab (all slabs at once)
        h = group_layer_norm(h, gln1_ref[...], ln1w_ref[...], ln1b_ref[...])

        # S: graph conv relu(A X W + b), all slabs via block-diagonal adjacency
        agg = jnp.dot(abig_ref[...], h, preferred_element_type=f32)
        h = jnp.maximum(jnp.dot(agg, ws_ref[...], preferred_element_type=f32)
                        + bs_ref[...], 0.0)

        # Output head: tconv1 (Kt, 1) -- static unroll over the Kt temporal taps
        acc = jnp.zeros((Mout, C), f32)
        for k in range(Kt):
            tap = jnp.dot(gsel_ref[k], h, preferred_element_type=f32)   # (Mout, C)
            acc = acc + jnp.dot(tap, w1_ref[k], preferred_element_type=f32)
        acc = acc + b1_ref[...]

        # LayerNorm([n, c]) per (b, t_out) slab
        y = group_layer_norm(acc, gln2_ref[...], ln2w_ref[...], ln2b_ref[...])

        # tconv2 (1x1) then fc (1x1 -> 1 channel); no activations in the head
        y = jnp.dot(y, w2_ref[...], preferred_element_type=f32) + b2_ref[...]
        yf = jnp.sum(y * wfc_ref[...], axis=-1, keepdims=True) + bfc_ref[...]
        o_ref[...] = yf.astype(o_ref.dtype)                        # (Mout, 1)

    operands = [xcat, wt, bt, gln1, ln1w, ln1b, abig, ws, bs,
                gsel, w1_stack, b1, gln2, ln2w, ln2b, w2, b2, wfc, bfc]

    in_specs = [pl.BlockSpec(a.shape, (lambda i, _n=a.ndim: (0,) * _n))
                for a in operands]

    bytes_accessed = int(sum(a.size * a.dtype.itemsize for a in operands)
                         + Mout * 4)
    flops = 2 * (M * (2 * Cin) * C            # temporal conv
                 + 3 * M * M * C              # first LN (x2 slab matmuls) + A_big
                 + M * C * C                  # graph-conv weight
                 + Kt * (Mout * M * C + Mout * C * C)   # tconv1 taps
                 + 2 * Mout * Mout * C        # second LN
                 + Mout * C * C + Mout * C)   # tconv2 + fc
    cost = pl.CostEstimate(flops=int(flops), transcendentals=int(M + Mout),
                           bytes_accessed=bytes_accessed)

    out = pl.pallas_call(
        kernel,
        out_shape=jax.ShapeDtypeStruct((Mout, 1), jnp.float32),
        grid=(1,),
        in_specs=in_specs,
        out_specs=pl.BlockSpec((Mout, 1), lambda i: (0, 0)),
        compiler_params=pltpu.CompilerParams(dimension_semantics=("arbitrary",)),
        cost_estimate=cost,
    )(*operands)

    # TODO(synk): if B/T/n are ever scaled up, tile M with a "parallel" grid axis
    # (multiples of 8 rows) and pad the output lane axis to >=128 for v7x megacore
    # sharding and unmasked stores; at the current KB-scale sizes one block is optimal.
    out = out.reshape(B, T_out, N1, 1)
    return jnp.transpose(out, (0, 3, 1, 2))                        # NCHW: (B,1,T_out,n)


# ----------------------------------------------------------------------------
# Deterministic synthetic parameters (shapes mirror STGCN_WAVE.__init__)
# ----------------------------------------------------------------------------

def init_stgcn_wave_params(key, c, T_ctor, n_ctor, control_str):
    keys = iter(jax.random.split(key, 4 * len(control_str) + 16))

    def rnd(shape, scale=0.1):
        return scale * jax.random.normal(next(keys), shape, jnp.float32)

    layer_params = []
    cnt, diapower = 0, 0
    for ch in control_str:
        if ch == "T":
            cin, cout = c[cnt], c[cnt + 1]
            layer_params.append(("T", dict(w=rnd((cout, cin, 2, 1)), b=rnd((cout,)))))
            diapower += 1
            cnt += 1
        elif ch == "S":
            ci = c[cnt]
            layer_params.append(("S", dict(w=rnd((ci, ci)), b=rnd((ci,)))))
        elif ch == "N":
            ci = c[cnt]
            layer_params.append(("N", dict(w=1.0 + rnd((n_ctor, ci)),
                                           b=rnd((n_ctor, ci)))))
    cc = c[cnt]
    Kt = T_ctor + 1 - 2 ** diapower
    out_params = dict(
        tconv1_w=rnd((cc, cc, Kt, 1)), tconv1_b=rnd((cc,)),
        ln_w=1.0 + rnd((n_ctor, cc)), ln_b=rnd((n_ctor, cc)),
        tconv2_w=rnd((cc, cc, 1, 1)), tconv2_b=rnd((cc,)),
        fc_w=rnd((1, cc, 1, 1)), fc_b=rnd((1,)),
    )
    return layer_params, out_params


def build_norm_adjacency(n):
    # Dense stand-in for the dgl graph Lk: ring graph + self loops, D^-1/2 A D^-1/2.
    idx = jnp.arange(n)
    a = jnp.eye(n, dtype=jnp.float32)
    a = a.at[idx, (idx + 1) % n].set(1.0)
    a = a.at[(idx + 1) % n, idx].set(1.0)
    d_inv_sqrt = 1.0 / jnp.sqrt(jnp.sum(a, axis=1))
    return a * d_inv_sqrt[:, None] * d_inv_sqrt[None, :]


if __name__ == "__main__":
    key = jax.random.PRNGKey(0)
    k_x, k_p = jax.random.split(key)

    # Input (PyTorch NCHW): batch=2, features=4, time=29, nodes=73.
    B, C0, T_in, n_in = 2, 4, 29, 73
    control_str = "TNS"
    c = [4, 32]

    # Stride-9 temporal conv output sizes -> the ctor args (T, n) the PyTorch module
    # needs for its LayerNorm / OutputLayer shapes to be consistent:
    T1 = (T_in - 1 - 1) // 9 + 1        # 4
    n1 = (n_in - 1) // 9 + 1            # 9
    T_ctor = T1 + 2 ** 1 - 1            # 5  (Kt = T_ctor + 1 - 2**diapower == T1)
    n_ctor = n1

    layer_params, out_params = init_stgcn_wave_params(k_p, c, T_ctor, n_ctor, control_str)
    a_norm = build_norm_adjacency(n_ctor)

    x = jax.random.normal(k_x, (B, C0, T_in, n_in), jnp.float32)

    fwd = jax.jit(lambda xx: stgcn_wave_forward(xx, layer_params, out_params,
                                                a_norm, control_str))
    out = jax.block_until_ready(fwd(x))
    assert out.shape == (B, 1, 1, n1), out.shape
    assert bool(jnp.all(jnp.isfinite(out)))
    print("KERNEL_OK")
</pallas_src>

<mosaic_0001>
module attributes {stable_mosaic.version = 11 : i64} {
  func.func @kernel(%arg0: i32, %arg1: memref<72x8xf32, #tpu.memory_space<vmem>>, %arg2: memref<8x32xf32, #tpu.memory_space<vmem>>, %arg3: memref<1x32xf32, #tpu.memory_space<vmem>>, %arg4: memref<72x72xf32, #tpu.memory_space<vmem>>, %arg5: memref<72x32xf32, #tpu.memory_space<vmem>>, %arg6: memref<72x32xf32, #tpu.memory_space<vmem>>, %arg7: memref<72x72xf32, #tpu.memory_space<vmem>>, %arg8: memref<32x32xf32, #tpu.memory_space<vmem>>, %arg9: memref<1x32xf32, #tpu.memory_space<vmem>>, %arg10: memref<4x18x72xf32, #tpu.memory_space<vmem>>, %arg11: memref<4x32x32xf32, #tpu.memory_space<vmem>>, %arg12: memref<1x32xf32, #tpu.memory_space<vmem>>, %arg13: memref<18x18xf32, #tpu.memory_space<vmem>>, %arg14: memref<18x32xf32, #tpu.memory_space<vmem>>, %arg15: memref<18x32xf32, #tpu.memory_space<vmem>>, %arg16: memref<32x32xf32, #tpu.memory_space<vmem>>, %arg17: memref<1x32xf32, #tpu.memory_space<vmem>>, %arg18: memref<1x32xf32, #tpu.memory_space<vmem>>, %arg19: memref<1x1xf32, #tpu.memory_space<vmem>>, %arg20: memref<18x1xf32, #tpu.memory_space<vmem>>) attributes {dimension_semantics = [#tpu.dimension_semantics<arbitrary>], iteration_bounds = array<i64: 1>, scalar_prefetch = 0 : i64, scratch_operands = 0 : i64, tpu.core_type = #tpu.core_type<tc>, window_params = [{pipeline_mode = #tpu.pipeline_mode<synchronous>, transform_indices = @transform_0, window_bounds = array<i64: 72, 8>}, {pipeline_mode = #tpu.pipeline_mode<synchronous>, transform_indices = @transform_1, window_bounds = array<i64: 8, 32>}, {pipeline_mode = #tpu.pipeline_mode<synchronous>, transform_indices = @transform_2, window_bounds = array<i64: 1, 32>}, {pipeline_mode = #tpu.pipeline_mode<synchronous>, transform_indices = @transform_3, window_bounds = array<i64: 72, 72>}, {pipeline_mode = #tpu.pipeline_mode<synchronous>, transform_indices = @transform_4, window_bounds = array<i64: 72, 32>}, {pipeline_mode = #tpu.pipeline_mode<synchronous>, transform_indices = @transform_5, window_bounds = array<i64: 72, 32>}, {pipeline_mode = #tpu.pipeline_mode<synchronous>, transform_indices = @transform_6, window_bounds = array<i64: 72, 72>}, {pipeline_mode = #tpu.pipeline_mode<synchronous>, transform_indices = @transform_7, window_bounds = array<i64: 32, 32>}, {pipeline_mode = #tpu.pipeline_mode<synchronous>, transform_indices = @transform_8, window_bounds = array<i64: 1, 32>}, {pipeline_mode = #tpu.pipeline_mode<synchronous>, transform_indices = @transform_9, window_bounds = array<i64: 4, 18, 72>}, {pipeline_mode = #tpu.pipeline_mode<synchronous>, transform_indices = @transform_10, window_bounds = array<i64: 4, 32, 32>}, {pipeline_mode = #tpu.pipeline_mode<synchronous>, transform_indices = @transform_11, window_bounds = array<i64: 1, 32>}, {pipeline_mode = #tpu.pipeline_mode<synchronous>, transform_indices = @transform_12, window_bounds = array<i64: 18, 18>}, {pipeline_mode = #tpu.pipeline_mode<synchronous>, transform_indices = @transform_13, window_bounds = array<i64: 18, 32>}, {pipeline_mode = #tpu.pipeline_mode<synchronous>, transform_indices = @transform_14, window_bounds = array<i64: 18, 32>}, {pipeline_mode = #tpu.pipeline_mode<synchronous>, transform_indices = @transform_15, window_bounds = array<i64: 32, 32>}, {pipeline_mode = #tpu.pipeline_mode<synchronous>, transform_indices = @transform_16, window_bounds = array<i64: 1, 32>}, {pipeline_mode = #tpu.pipeline_mode<synchronous>, transform_indices = @transform_17, window_bounds = array<i64: 1, 32>}, {pipeline_mode = #tpu.pipeline_mode<synchronous>, transform_indices = @transform_18, window_bounds = array<i64: 1, 1>}, {pipeline_mode = #tpu.pipeline_mode<synchronous>, transform_indices = @transform_19, window_bounds = array<i64: 18, 1>}]} {
    %c0 = arith.constant 0 : index
    %c0_0 = arith.constant 0 : index
    %0 = vector.load %arg1[%c0, %c0_0] : memref<72x8xf32, #tpu.memory_space<vmem>>, vector<72x8xf32>
    %c0_1 = arith.constant 0 : index
    %c0_2 = arith.constant 0 : index
    %1 = vector.load %arg2[%c0_1, %c0_2] : memref<8x32xf32, #tpu.memory_space<vmem>>, vector<8x32xf32>
    %cst = arith.constant dense<0.000000e+00> : vector<72x32xf32>
    %2 = tpu.matmul %0, %1, %cst {dimension_numbers = #tpu.dot_dimension_numbers<[1], [0], [0], [1], [0, 0, 1, 1], [], []>} : vector<72x8xf32>, vector<8x32xf32>, vector<72x32xf32> -> vector<72x32xf32>
    %c0_3 = arith.constant 0 : index
    %c0_4 = arith.constant 0 : index
    %3 = vector.load %arg3[%c0_3, %c0_4] : memref<1x32xf32, #tpu.memory_space<vmem>>, vector<1x32xf32>
    %4 = vector.broadcast %3 : vector<1x32xf32> to vector<72x32xf32>
    %5 = arith.addf %2, %4 : vector<72x32xf32>
    %cst_5 = arith.constant 0.000000e+00 : f32
    %6 = vector.broadcast %cst_5 : f32 to vector<72x32xf32>
    %7 = arith.maximumf %5, %6 : vector<72x32xf32>
    %c0_6 = arith.constant 0 : index
    %c0_7 = arith.constant 0 : index
    %8 = vector.load %arg4[%c0_6, %c0_7] : memref<72x72xf32, #tpu.memory_space<vmem>>, vector<72x72xf32>
    %c0_8 = arith.constant 0 : index
    %c0_9 = arith.constant 0 : index
    %9 = vector.load %arg5[%c0_8, %c0_9] : memref<72x32xf32, #tpu.memory_space<vmem>>, vector<72x32xf32>
    %c0_10 = arith.constant 0 : index
    %c0_11 = arith.constant 0 : index
    %10 = vector.load %arg6[%c0_10, %c0_11] : memref<72x32xf32, #tpu.memory_space<vmem>>, vector<72x32xf32>
    %cst_12 = arith.constant dense<0.000000e+00> : vector<72x32xf32>
    %11 = tpu.matmul %8, %7, %cst_12 {dimension_numbers = #tpu.dot_dimension_numbers<[1], [0], [0], [1], [0, 0, 1, 1], [], []>} : vector<72x72xf32>, vector<72x32xf32>, vector<72x32xf32> -> vector<72x32xf32>
    %cst_13 = arith.constant dense<0.000000e+00> : vector<72xf32>
    %12 = vector.multi_reduction <add>, %11, %cst_13 [1] : vector<72x32xf32> to vector<72xf32>
    %13 = vector.shape_cast %12 : vector<72xf32> to vector<72x1xf32>
    %cst_14 = arith.constant 0.00347222225 : f32
    %14 = vector.broadcast %cst_14 : f32 to vector<72x1xf32>
    %15 = arith.mulf %13, %14 : vector<72x1xf32>
    %16 = vector.broadcast %15 : vector<72x1xf32> to vector<72x32xf32>
    %17 = arith.subf %7, %16 : vector<72x32xf32>
    %18 = arith.mulf %17, %17 : vector<72x32xf32>
    %cst_15 = arith.constant dense<0.000000e+00> : vector<72x32xf32>
    %19 = tpu.matmul %8, %18, %cst_15 {dimension_numbers = #tpu.dot_dimension_numbers<[1], [0], [0], [1], [0, 0, 1, 1], [], []>} : vector<72x72xf32>, vector<72x32xf32>, vector<72x32xf32> -> vector<72x32xf32>
    %cst_16 = arith.constant dense<0.000000e+00> : vector<72xf32>
    %20 = vector.multi_reduction <add>, %19, %cst_16 [1] : vector<72x32xf32> to vector<72xf32>
    %21 = vector.shape_cast %20 : vector<72xf32> to vector<72x1xf32>
    %cst_17 = arith.constant 0.00347222225 : f32
    %22 = vector.broadcast %cst_17 : f32 to vector<72x1xf32>
    %23 = arith.mulf %21, %22 : vector<72x1xf32>
    %cst_18 = arith.constant 9.99999974E-6 : f32
    %24 = vector.broadcast %cst_18 : f32 to vector<72x1xf32>
    %25 = arith.addf %23, %24 : vector<72x1xf32>
    %26 = math.rsqrt %25 : vector<72x1xf32>
    %27 = vector.broadcast %26 : vector<72x1xf32> to vector<72x32xf32>
    %28 = arith.mulf %17, %27 : vector<72x32xf32>
    %29 = arith.mulf %28, %9 : vector<72x32xf32>
    %30 = arith.addf %29, %10 : vector<72x32xf32>
    %c0_19 = arith.constant 0 : index
    %c0_20 = arith.constant 0 : index
    %31 = vector.load %arg7[%c0_19, %c0_20] : memref<72x72xf32, #tpu.memory_space<vmem>>, vector<72x72xf32>
    %cst_21 = arith.constant dense<0.000000e+00> : vector<72x32xf32>
    %32 = tpu.matmul %31, %30, %cst_21 {dimension_numbers = #tpu.dot_dimension_numbers<[1], [0], [0], [1], [0, 0, 1, 1], [], []>} : vector<72x72xf32>, vector<72x32xf32>, vector<72x32xf32> -> vector<72x32xf32>
    %c0_22 = arith.constant 0 : index
    %c0_23 = arith.constant 0 : index
    %33 = vector.load %arg8[%c0_22, %c0_23] : memref<32x32xf32, #tpu.memory_space<vmem>>, vector<32x32xf32>
    %cst_24 = arith.constant dense<0.000000e+00> : vector<72x32xf32>
    %34 = tpu.matmul %32, %33, %cst_24 {dimension_numbers = #tpu.dot_dimension_numbers<[1], [0], [0], [1], [0, 0, 1, 1], [], []>} : vector<72x32xf32>, vector<32x32xf32>, vector<72x32xf32> -> vector<72x32xf32>
    %c0_25 = arith.constant 0 : index
    %c0_26 = arith.constant 0 : index
    %35 = vector.load %arg9[%c0_25, %c0_26] : memref<1x32xf32, #tpu.memory_space<vmem>>, vector<1x32xf32>
    %36 = vector.broadcast %35 : vector<1x32xf32> to vector<72x32xf32>
    %37 = arith.addf %34, %36 : vector<72x32xf32>
    %cst_27 = arith.constant 0.000000e+00 : f32
    %38 = vector.broadcast %cst_27 : f32 to vector<72x32xf32>
    %39 = arith.maximumf %37, %38 : vector<72x32xf32>
    %cst_28 = arith.constant 0.000000e+00 : f32
    %40 = vector.broadcast %cst_28 : f32 to vector<18x32xf32>
    %c0_29 = arith.constant 0 : index
    %c0_30 = arith.constant 0 : index
    %c0_31 = arith.constant 0 : index
    %41 = vector.load %arg10[%c0_29, %c0_30, %c0_31] : memref<4x18x72xf32, #tpu.memory_space<vmem>>, vector<1x18x72xf32>
    %42 = vector.shape_cast %41 : vector<1x18x72xf32> to vector<18x72xf32>
    %cst_32 = arith.constant dense<0.000000e+00> : vector<18x32xf32>
    %43 = tpu.matmul %42, %39, %cst_32 {dimension_numbers = #tpu.dot_dimension_numbers<[1], [0], [0], [1], [0, 0, 1, 1], [], []>} : vector<18x72xf32>, vector<72x32xf32>, vector<18x32xf32> -> vector<18x32xf32>
    %c0_33 = arith.constant 0 : index
    %c0_34 = arith.constant 0 : index
    %c0_35 = arith.constant 0 : index
    %44 = vector.load %arg11[%c0_33, %c0_34, %c0_35] : memref<4x32x32xf32, #tpu.memory_space<vmem>>, vector<1x32x32xf32>
    %45 = vector.shape_cast %44 : vector<1x32x32xf32> to vector<32x32xf32>
    %cst_36 = arith.constant dense<0.000000e+00> : vector<18x32xf32>
    %46 = tpu.matmul %43, %45, %cst_36 {dimension_numbers = #tpu.dot_dimension_numbers<[1], [0], [0], [1], [0, 0, 1, 1], [], []>} : vector<18x32xf32>, vector<32x32xf32>, vector<18x32xf32> -> vector<18x32xf32>
    %47 = arith.addf %40, %46 : vector<18x32xf32>
    %c1 = arith.constant 1 : index
    %c0_37 = arith.constant 0 : index
    %c0_38 = arith.constant 0 : index
    %48 = vector.load %arg10[%c1, %c0_37, %c0_38] : memref<4x18x72xf32, #tpu.memory_space<vmem>>, vector<1x18x72xf32>
    %49 = vector.shape_cast %48 : vector<1x18x72xf32> to vector<18x72xf32>
    %cst_39 = arith.constant dense<0.000000e+00> : vector<18x32xf32>
    %50 = tpu.matmul %49, %39, %cst_39 {dimension_numbers = #tpu.dot_dimension_numbers<[1], [0], [0], [1], [0, 0, 1, 1], [], []>} : vector<18x72xf32>, vector<72x32xf32>, vector<18x32xf32> -> vector<18x32xf32>
    %c1_40 = arith.constant 1 : index
    %c0_41 = arith.constant 0 : index
    %c0_42 = arith.constant 0 : index
    %51 = vector.load %arg11[%c1_40, %c0_41, %c0_42] : memref<4x32x32xf32, #tpu.memory_space<vmem>>, vector<1x32x32xf32>
    %52 = vector.shape_cast %51 : vector<1x32x32xf32> to vector<32x32xf32>
    %cst_43 = arith.constant dense<0.000000e+00> : vector<18x32xf32>
    %53 = tpu.matmul %50, %52, %cst_43 {dimension_numbers = #tpu.dot_dimension_numbers<[1], [0], [0], [1], [0, 0, 1, 1], [], []>} : vector<18x32xf32>, vector<32x32xf32>, vector<18x32xf32> -> vector<18x32xf32>
    %54 = arith.addf %47, %53 : vector<18x32xf32>
    %c2 = arith.constant 2 : index
    %c0_44 = arith.constant 0 : index
    %c0_45 = arith.constant 0 : index
    %55 = vector.load %arg10[%c2, %c0_44, %c0_45] : memref<4x18x72xf32, #tpu.memory_space<vmem>>, vector<1x18x72xf32>
    %56 = vector.shape_cast %55 : vector<1x18x72xf32> to vector<18x72xf32>
    %cst_46 = arith.constant dense<0.000000e+00> : vector<18x32xf32>
    %57 = tpu.matmul %56, %39, %cst_46 {dimension_numbers = #tpu.dot_dimension_numbers<[1], [0], [0], [1], [0, 0, 1, 1], [], []>} : vector<18x72xf32>, vector<72x32xf32>, vector<18x32xf32> -> vector<18x32xf32>
    %c2_47 = arith.constant 2 : index
    %c0_48 = arith.constant 0 : index
    %c0_49 = arith.constant 0 : index
    %58 = vector.load %arg11[%c2_47, %c0_48, %c0_49] : memref<4x32x32xf32, #tpu.memory_space<vmem>>, vector<1x32x32xf32>
    %59 = vector.shape_cast %58 : vector<1x32x32xf32> to vector<32x32xf32>
    %cst_50 = arith.constant dense<0.000000e+00> : vector<18x32xf32>
    %60 = tpu.matmul %57, %59, %cst_50 {dimension_numbers = #tpu.dot_dimension_numbers<[1], [0], [0], [1], [0, 0, 1, 1], [], []>} : vector<18x32xf32>, vector<32x32xf32>, vector<18x32xf32> -> vector<18x32xf32>
    %61 = arith.addf %54, %60 : vector<18x32xf32>
    %c3 = arith.constant 3 : index
    %c0_51 = arith.constant 0 : index
    %c0_52 = arith.constant 0 : index
    %62 = vector.load %arg10[%c3, %c0_51, %c0_52] : memref<4x18x72xf32, #tpu.memory_space<vmem>>, vector<1x18x72xf32>
    %63 = vector.shape_cast %62 : vector<1x18x72xf32> to vector<18x72xf32>
    %cst_53 = arith.constant dense<0.000000e+00> : vector<18x32xf32>
    %64 = tpu.matmul %63, %39, %cst_53 {dimension_numbers = #tpu.dot_dimension_numbers<[1], [0], [0], [1], [0, 0, 1, 1], [], []>} : vector<18x72xf32>, vector<72x32xf32>, vector<18x32xf32> -> vector<18x32xf32>
    %c3_54 = arith.constant 3 : index
    %c0_55 = arith.constant 0 : index
    %c0_56 = arith.constant 0 : index
    %65 = vector.load %arg11[%c3_54, %c0_55, %c0_56] : memref<4x32x32xf32, #tpu.memory_space<vmem>>, vector<1x32x32xf32>
    %66 = vector.shape_cast %65 : vector<1x32x32xf32> to vector<32x32xf32>
    %cst_57 = arith.constant dense<0.000000e+00> : vector<18x32xf32>
    %67 = tpu.matmul %64, %66, %cst_57 {dimension_numbers = #tpu.dot_dimension_numbers<[1], [0], [0], [1], [0, 0, 1, 1], [], []>} : vector<18x32xf32>, vector<32x32xf32>, vector<18x32xf32> -> vector<18x32xf32>
    %68 = arith.addf %61, %67 : vector<18x32xf32>
    %c0_58 = arith.constant 0 : index
    %c0_59 = arith.constant 0 : index
    %69 = vector.load %arg12[%c0_58, %c0_59] : memref<1x32xf32, #tpu.memory_space<vmem>>, vector<1x32xf32>
    %70 = vector.broadcast %69 : vector<1x32xf32> to vector<18x32xf32>
    %71 = arith.addf %68, %70 : vector<18x32xf32>
    %c0_60 = arith.constant 0 : index
    %c0_61 = arith.constant 0 : index
    %72 = vector.load %arg13[%c0_60, %c0_61] : memref<18x18xf32, #tpu.memory_space<vmem>>, vector<18x18xf32>
    %c0_62 = arith.constant 0 : index
    %c0_63 = arith.constant 0 : index
    %73 = vector.load %arg14[%c0_62, %c0_63] : memref<18x32xf32, #tpu.memory_space<vmem>>, vector<18x32xf32>
    %c0_64 = arith.constant 0 : index
    %c0_65 = arith.constant 0 : index
    %74 = vector.load %arg15[%c0_64, %c0_65] : memref<18x32xf32, #tpu.memory_space<vmem>>, vector<18x32xf32>
    %cst_66 = arith.constant dense<0.000000e+00> : vector<18x32xf32>
    %75 = tpu.matmul %72, %71, %cst_66 {dimension_numbers = #tpu.dot_dimension_numbers<[1], [0], [0], [1], [0, 0, 1, 1], [], []>} : vector<18x18xf32>, vector<18x32xf32>, vector<18x32xf32> -> vector<18x32xf32>
    %cst_67 = arith.constant dense<0.000000e+00> : vector<18xf32>
    %76 = vector.multi_reduction <add>, %75, %cst_67 [1] : vector<18x32xf32> to vector<18xf32>
    %77 = vector.shape_cast %76 : vector<18xf32> to vector<18x1xf32>
    %cst_68 = arith.constant 0.00347222225 : f32
    %78 = vector.broadcast %cst_68 : f32 to vector<18x1xf32>
    %79 = arith.mulf %77, %78 : vector<18x1xf32>
    %80 = vector.broadcast %79 : vector<18x1xf32> to vector<18x32xf32>
    %81 = arith.subf %71, %80 : vector<18x32xf32>
    %82 = arith.mulf %81, %81 : vector<18x32xf32>
    %cst_69 = arith.constant dense<0.000000e+00> : vector<18x32xf32>
    %83 = tpu.matmul %72, %82, %cst_69 {dimension_numbers = #tpu.dot_dimension_numbers<[1], [0], [0], [1], [0, 0, 1, 1], [], []>} : vector<18x18xf32>, vector<18x32xf32>, vector<18x32xf32> -> vector<18x32xf32>
    %cst_70 = arith.constant dense<0.000000e+00> : vector<18xf32>
    %84 = vector.multi_reduction <add>, %83, %cst_70 [1] : vector<18x32xf32> to vector<18xf32>
    %85 = vector.shape_cast %84 : vector<18xf32> to vector<18x1xf32>
    %cst_71 = arith.constant 0.00347222225 : f32
    %86 = vector.broadcast %cst_71 : f32 to vector<18x1xf32>
    %87 = arith.mulf %85, %86 : vector<18x1xf32>
    %cst_72 = arith.constant 9.99999974E-6 : f32
    %88 = vector.broadcast %cst_72 : f32 to vector<18x1xf32>
    %89 = arith.addf %87, %88 : vector<18x1xf32>
    %90 = math.rsqrt %89 : vector<18x1xf32>
    %91 = vector.broadcast %90 : vector<18x1xf32> to vector<18x32xf32>
    %92 = arith.mulf %81, %91 : vector<18x32xf32>
    %93 = arith.mulf %92, %73 : vector<18x32xf32>
    %94 = arith.addf %93, %74 : vector<18x32xf32>
    %c0_73 = arith.constant 0 : index
    %c0_74 = arith.constant 0 : index
    %95 = vector.load %arg16[%c0_73, %c0_74] : memref<32x32xf32, #tpu.memory_space<vmem>>, vector<32x32xf32>
    %cst_75 = arith.constant dense<0.000000e+00> : vector<18x32xf32>
    %96 = tpu.matmul %94, %95, %cst_75 {dimension_numbers = #tpu.dot_dimension_numbers<[1], [0], [0], [1], [0, 0, 1, 1], [], []>} : vector<18x32xf32>, vector<32x32xf32>, vector<18x32xf32> -> vector<18x32xf32>
    %c0_76 = arith.constant 0 : index
    %c0_77 = arith.constant 0 : index
    %97 = vector.load %arg17[%c0_76, %c0_77] : memref<1x32xf32, #tpu.memory_space<vmem>>, vector<1x32xf32>
    %98 = vector.broadcast %97 : vector<1x32xf32> to vector<18x32xf32>
    %99 = arith.addf %96, %98 : vector<18x32xf32>
    %c0_78 = arith.constant 0 : index
    %c0_79 = arith.constant 0 : index
    %100 = vector.load %arg18[%c0_78, %c0_79] : memref<1x32xf32, #tpu.memory_space<vmem>>, vector<1x32xf32>
    %101 = vector.broadcast %100 : vector<1x32xf32> to vector<18x32xf32>
    %102 = arith.mulf %99, %101 : vector<18x32xf32>
    %cst_80 = arith.constant dense<0.000000e+00> : vector<18xf32>
    %103 = vector.multi_reduction <add>, %102, %cst_80 [1] : vector<18x32xf32> to vector<18xf32>
    %104 = vector.shape_cast %103 : vector<18xf32> to vector<18x1xf32>
    %c0_81 = arith.constant 0 : index
    %c0_82 = arith.constant 0 : index
    %105 = vector.load %arg19[%c0_81, %c0_82] : memref<1x1xf32, #tpu.memory_space<vmem>>, vector<1x1xf32>
    %106 = vector.broadcast %105 : vector<1x1xf32> to vector<18x1xf32>
    %107 = arith.addf %104, %106 : vector<18x1xf32>
    %c0_83 = arith.constant 0 : index
    %c0_84 = arith.constant 0 : index
    %108 = vector.load %arg20[%c0_83, %c0_84] : memref<18x1xf32, #tpu.memory_space<vmem>>, vector<18x1xf32>
    tpu.vector_store %arg20[%c0_83, %c0_84], %107 {strides = array<i32>} : memref<18x1xf32, #tpu.memory_space<vmem>>, vector<18x1xf32>,
    return
  }
  func.func @transform_0(%arg0: i32) -> (i32, i32) {
    %c0_i32 = arith.constant 0 : i32
    %c0_i32_0 = arith.constant 0 : i32
    %c0_i32_1 = arith.constant 0 : i32
    return %c0_i32, %c0_i32_0 : i32, i32
  }
  func.func @transform_1(%arg0: i32) -> (i32, i32) {
    %c0_i32 = arith.constant 0 : i32
    %c0_i32_0 = arith.constant 0 : i32
    %c0_i32_1 = arith.constant 0 : i32
    return %c0_i32, %c0_i32_0 : i32, i32
  }
  func.func @transform_2(%arg0: i32) -> (i32, i32) {
    %c0_i32 = arith.constant 0 : i32
    %c0_i32_0 = arith.constant 0 : i32
    %c0_i32_1 = arith.constant 0 : i32
    return %c0_i32, %c0_i32_0 : i32, i32
  }
  func.func @transform_3(%arg0: i32) -> (i32, i32) {
    %c0_i32 = arith.constant 0 : i32
    %c0_i32_0 = arith.constant 0 : i32
    %c0_i32_1 = arith.constant 0 : i32
    return %c0_i32, %c0_i32_0 : i32, i32
  }
  func.func @transform_4(%arg0: i32) -> (i32, i32) {
    %c0_i32 = arith.constant 0 : i32
    %c0_i32_0 = arith.constant 0 : i32
    %c0_i32_1 = arith.constant 0 : i32
    return %c0_i32, %c0_i32_0 : i32, i32
  }
  func.func @transform_5(%arg0: i32) -> (i32, i32) {
    %c0_i32 = arith.constant 0 : i32
    %c0_i32_0 = arith.constant 0 : i32
    %c0_i32_1 = arith.constant 0 : i32
    return %c0_i32, %c0_i32_0 : i32, i32
  }
  func.func @transform_6(%arg0: i32) -> (i32, i32) {
    %c0_i32 = arith.constant 0 : i32
    %c0_i32_0 = arith.constant 0 : i32
    %c0_i32_1 = arith.constant 0 : i32
    return %c0_i32, %c0_i32_0 : i32, i32
  }
  func.func @transform_7(%arg0: i32) -> (i32, i32) {
    %c0_i32 = arith.constant 0 : i32
    %c0_i32_0 = arith.constant 0 : i32
    %c0_i32_1 = arith.constant 0 : i32
    return %c0_i32, %c0_i32_0 : i32, i32
  }
  func.func @transform_8(%arg0: i32) -> (i32, i32) {
    %c0_i32 = arith.constant 0 : i32
    %c0_i32_0 = arith.constant 0 : i32
    %c0_i32_1 = arith.constant 0 : i32
    return %c0_i32, %c0_i32_0 : i32, i32
  }
  func.func @transform_9(%arg0: i32) -> (i32, i32, i32) {
    %c0_i32 = arith.constant 0 : i32
    %c0_i32_0 = arith.constant 0 : i32
    %c0_i32_1 = arith.constant 0 : i32
    %c0_i32_2 = arith.constant 0 : i32
    return %c0_i32, %c0_i32_0, %c0_i32_1 : i32, i32, i32
  }
  func.func @transform_10(%arg0: i32) -> (i32, i32, i32) {
    %c0_i32 = arith.constant 0 : i32
    %c0_i32_0 = arith.constant 0 : i32
    %c0_i32_1 = arith.constant 0 : i32
    %c0_i32_2 = arith.constant 0 : i32
    return %c0_i32, %c0_i32_0, %c0_i32_1 : i32, i32, i32
  }
  func.func @transform_11(%arg0: i32) -> (i32, i32) {
    %c0_i32 = arith.constant 0 : i32
    %c0_i32_0 = arith.constant 0 : i32
    %c0_i32_1 = arith.constant 0 : i32
    return %c0_i32, %c0_i32_0 : i32, i32
  }
  func.func @transform_12(%arg0: i32) -> (i32, i32) {
    %c0_i32 = arith.constant 0 : i32
    %c0_i32_0 = arith.constant 0 : i32
    %c0_i32_1 = arith.constant 0 : i32
    return %c0_i32, %c0_i32_0 : i32, i32
  }
  func.func @transform_13(%arg0: i32) -> (i32, i32) {
    %c0_i32 = arith.constant 0 : i32
    %c0_i32_0 = arith.constant 0 : i32
    %c0_i32_1 = arith.constant 0 : i32
    return %c0_i32, %c0_i32_0 : i32, i32
  }
  func.func @transform_14(%arg0: i32) -> (i32, i32) {
    %c0_i32 = arith.constant 0 : i32
    %c0_i32_0 = arith.constant 0 : i32
    %c0_i32_1 = arith.constant 0 : i32
    return %c0_i32, %c0_i32_0 : i32, i32
  }
  func.func @transform_15(%arg0: i32) -> (i32, i32) {
    %c0_i32 = arith.constant 0 : i32
    %c0_i32_0 = arith.constant 0 : i32
    %c0_i32_1 = arith.constant 0 : i32
    return %c0_i32, %c0_i32_0 : i32, i32
  }
  func.func @transform_16(%arg0: i32) -> (i32, i32) {
    %c0_i32 = arith.constant 0 : i32
    %c0_i32_0 = arith.constant 0 : i32
    %c0_i32_1 = arith.constant 0 : i32
    return %c0_i32, %c0_i32_0 : i32, i32
  }
  func.func @transform_17(%arg0: i32) -> (i32, i32) {
    %c0_i32 = arith.constant 0 : i32
    %c0_i32_0 = arith.constant 0 : i32
    %c0_i32_1 = arith.constant 0 : i32
    return %c0_i32, %c0_i32_0 : i32, i32
  }
  func.func @transform_18(%arg0: i32) -> (i32, i32) {
    %c0_i32 = arith.constant 0 : i32
    %c0_i32_0 = arith.constant 0 : i32
    %c0_i32_1 = arith.constant 0 : i32
    return %c0_i32, %c0_i32_0 : i32, i32
  }
  func.func @transform_19(%arg0: i32) -> (i32, i32) {
    %c0_i32 = arith.constant 0 : i32
    %c0_i32_0 = arith.constant 0 : i32
    %c0_i32_1 = arith.constant 0 : i32
    return %c0_i32, %c0_i32_0 : i32, i32
  }
}

</mosaic_0001>

<bundles_post_ra>
// kernel: mul.51
= control target key start
LH: loop header
LB: loop body
LE: loop exit
PB: predicated region body
PF: predicated region fallthrough
CT: control target
= control target key end

     0   :  { %s210_s0 = inlined_call_operand.vmem [shape: f32[72,72], index: 0, kind: input, shape index: {}]   ;;  %s211_s1 = inlined_call_operand.vmem [shape: f32[72,72], index: 1, kind: input, shape index: {}]   ;;  %s212_s2 = inlined_call_operand.vmem [shape: f32[72,72], index: 2, kind: output, shape index: {}]  }
   0x1   :  { %v3_v0 = vld [vmem:[%s210_s0] sm:$0xff]  ;;  %v90_v2 = vld [vmem:[%s210_s0 + $0x8] sm:$0xff]  ;;  %v93_v5 = vld [vmem:[%s210_s0 + $0x10] sm:$0xff] }
   0x2   :  { %v4_v1 = vld [vmem:[%s211_s1] sm:$0xff]  ;;  %v91_v4 = vld [vmem:[%s211_s1 + $0x8] sm:$0xff]  ;;  %v94_v6 = vld [vmem:[%s211_s1 + $0x10] sm:$0xff] }
   0x3   :  { %v7_v3 = vmul.f32 %v4_v1, %v3_v0  ;;  %v16_v7 = vmul.f32 %v91_v4, %v90_v2  ;;  %v26_v8 = vmul.f32 %v94_v6, %v93_v5  ;;  %v96_v9 = vld [vmem:[%s210_s0 + $0x18] sm:$0xff]  ;;  %v99_v11 = vld [vmem:[%s210_s0 + $0x20] sm:$0xff]  ;;  %v102_v14 = vld [vmem:[%s210_s0 + $0x28] sm:$0xff] }
   0x4   :  { %v97_v10 = vld [vmem:[%s211_s1 + $0x18] sm:$0xff]  ;;  %v100_v13 = vld [vmem:[%s211_s1 + $0x20] sm:$0xff]  ;;  %v103_v15 = vld [vmem:[%s211_s1 + $0x28] sm:$0xff] }
   0x5   :  { %9 = vst [vmem:[%s212_s2] sm:$0xff] %v7_v3  ;;  %v36_v12 = vmul.f32 %v97_v10, %v96_v9  ;;  %v46_v16 = vmul.f32 %v100_v13, %v99_v11  ;;  %v56_v17 = vmul.f32 %v103_v15, %v102_v14  ;;  %v105_v18 = vld [vmem:[%s210_s0 + $0x30] sm:$0xff]  ;;  %v108_v20 = vld [vmem:[%s210_s0 + $0x38] sm:$0xff]  ;;  %v111_v23 = vld [vmem:[%s210_s0 + $0x40] sm:$0xff] }
   0x6   :  { %92 = vst [vmem:[%s212_s2 + $0x8] sm:$0xff] %v16_v7  ;;  %v106_v19 = vld [vmem:[%s211_s1 + $0x30] sm:$0xff]  ;;  %v109_v22 = vld [vmem:[%s211_s1 + $0x38] sm:$0xff]  ;;  %v112_v24 = vld [vmem:[%s211_s1 + $0x40] sm:$0xff] }
   0x7   :  { %95 = vst [vmem:[%s212_s2 + $0x10] sm:$0xff] %v26_v8  ;;  %v66_v21 = vmul.f32 %v106_v19, %v105_v18  ;;  %v76_v25 = vmul.f32 %v109_v22, %v108_v20  ;;  %v86_v26 = vmul.f32 %v112_v24, %v111_v23 }
   0x8   :  { %98 = vst [vmem:[%s212_s2 + $0x18] sm:$0xff] %v36_v12 }
   0x9   :  { %101 = vst [vmem:[%s212_s2 + $0x20] sm:$0xff] %v46_v16 }
   0xa   :  { %104 = vst [vmem:[%s212_s2 + $0x28] sm:$0xff] %v56_v17 }
   0xb   :  { %107 = vst [vmem:[%s212_s2 + $0x30] sm:$0xff] %v66_v21 }
   0xc   :  { %110 = vst [vmem:[%s212_s2 + $0x38] sm:$0xff] %v76_v25 }
   0xd   :  { %113 = vst [vmem:[%s212_s2 + $0x40] sm:$0xff] %v86_v26 }

// kernel: tile.19
= control target key start
LH: loop header
LB: loop body
LE: loop exit
PB: predicated region body
PF: predicated region fallthrough
CT: control target
= control target key end

     0   :  { %vm3_vm0 = vcmask 261120   ;;  %s6_s6 = smov 3  ;;  %s22_s7 = smov 3  ;;  %s180_s0 = inlined_call_operand.vmem [shape: f32[8,9,32], index: 0, kind: input, shape index: {}]   ;;  %s181_s1 = inlined_call_operand.vmem [shape: f32[72,32], index: 1, kind: output, shape index: {}]  }
   0x1   :  { %v2_v0 = vld [vmem:[%s180_s0] sm:$0xff]   ;;  %v66_v2 = vld [vmem:[%s180_s0 + $0x11] sm:$0xff]   ;;  %s38_s22 = smov 3 }
   0x2   :  { %v64_v1 = vld [vmem:[%s180_s0 + $0x8] ss:$8 sm:%s6_s6]   ;;  %4 = vst.msk [vmem:[%s181_s1] sm:$0xff] %vm3_vm0, %v2_v0   ;;  %s54_s6 = smov 3 }
   0x3   :  { %v68_v3 = vld [vmem:[%s180_s0 + $0x20] sm:$0xff]   ;;  %65 = vst.msk [vmem:[%s181_s1 + $0x8] sm:$0x3] %vm3_vm0, %v64_v1   ;;  %v72_v5 = vld [vmem:[%s180_s0 + $0x31] sm:$0xff]  }
   0x4   :  { %v70_v4 = vld [vmem:[%s180_s0 + $0x28] ss:$8 sm:%s22_s7]   ;;  %67 = vst.msk [vmem:[%s181_s1 + $0xa] sm:$0xff] %vm3_vm0, %v66_v2  }
   0x5   :  { %69 = vst.msk [vmem:[%s181_s1 + $0x12] sm:$0xff] %vm3_vm0, %v68_v3   ;;  %v74_v6 = vld [vmem:[%s180_s0 + $0x40] sm:$0xff]   ;;  %v78_v8 = vld [vmem:[%s180_s0 + $0x51] sm:$0xff]  }
   0x6   :  { %71 = vst.msk [vmem:[%s181_s1 + $0x1a] sm:$0x3] %vm3_vm0, %v70_v4   ;;  %v76_v7 = vld [vmem:[%s180_s0 + $0x48] ss:$8 sm:%s38_s22]  }
   0x7   :  { %73 = vst.msk [vmem:[%s181_s1 + $0x1c] sm:$0xff] %vm3_vm0, %v72_v5   ;;  %v80_v9 = vld [vmem:[%s180_s0 + $0x60] sm:$0xff]   ;;  %v84_v11 = vld [vmem:[%s180_s0 + $0x71] sm:$0xff]  }
   0x8   :  { %75 = vst.msk [vmem:[%s181_s1 + $0x24] sm:$0xff] %vm3_vm0, %v74_v6   ;;  %v82_v10 = vld [vmem:[%s180_s0 + $0x68] ss:$8 sm:%s54_s6]  }
   0x9   :  { %77 = vst.msk [vmem:[%s181_s1 + $0x2c] sm:$0x3] %vm3_vm0, %v76_v7  }
   0xa   :  { %79 = vst.msk [vmem:[%s181_s1 + $0x2e] sm:$0xff] %vm3_vm0, %v78_v8  }
   0xb   :  { %81 = vst.msk [vmem:[%s181_s1 + $0x36] sm:$0xff] %vm3_vm0, %v80_v9  }
   0xc   :  { %83 = vst.msk [vmem:[%s181_s1 + $0x3e] sm:$0x3] %vm3_vm0, %v82_v10  }
   0xd   :  { %85 = vst.msk [vmem:[%s181_s1 + $0x40] sm:$0xff] %vm3_vm0, %v84_v11  }

// kernel: tile.27
= control target key start
LH: loop header
LB: loop body
LE: loop exit
PB: predicated region body
PF: predicated region fallthrough
CT: control target
= control target key end

     0   :  { %vm3_vm0 = vcmask 261120   ;;  %s6_s6 = smov 3  ;;  %s48_s0 = inlined_call_operand.vmem [shape: f32[2,9,32], index: 0, kind: input, shape index: {}]   ;;  %s49_s1 = inlined_call_operand.vmem [shape: f32[18,32], index: 1, kind: output, shape index: {}]  }
   0x1   :  { %v2_v0 = vld [vmem:[%s48_s0] sm:$0xff]   ;;  %v18_v2 = vld [vmem:[%s48_s0 + $0x11] sm:$0xff]  }
   0x2   :  { %v16_v1 = vld [vmem:[%s48_s0 + $0x8] ss:$8 sm:%s6_s6]   ;;  %4 = vst.msk [vmem:[%s49_s1] sm:$0xff] %vm3_vm0, %v2_v0  }
   0x3   :  { %17 = vst.msk [vmem:[%s49_s1 + $0x8] sm:$0x3] %vm3_vm0, %v16_v1  }
   0x4   :  { %19 = vst.msk [vmem:[%s49_s1 + $0xa] sm:$0xff] %vm3_vm0, %v18_v2  }

// kernel: _lambda_.1
= control target key start
LH: loop header
LB: loop body
LE: loop exit
PB: predicated region body
PF: predicated region fallthrough
CT: control target
= control target key end

     0   :  { %vm78_vm0 = vcmask 64512   ;;  %vm186_vm1 = vcmask 588800   ;;  %vm258_vm2 = vcmask 261120   ;;  %s2242_s1 = inlined_call_operand.vmem [shape: f32[8,32], index: 1, kind: input, shape index: {}]   ;;  %s2243_s0 = inlined_call_operand.vmem [shape: f32[72,8], index: 0, kind: input, shape index: {}]   ;;  %s2244_s2 = inlined_call_operand.vmem [shape: f32[1,32], index: 2, kind: input, shape index: {}]   ;;  %s2245_s3 = inlined_call_operand.vmem [shape: f32[72,72], index: 3, kind: input, shape index: {}]   ;;  %s2246_s4 = inlined_call_operand.vmem [shape: f32[72,32], index: 4, kind: input, shape index: {}]   ;;  %s2247_s5 = inlined_call_operand.vmem [shape: f32[72,32], index: 5, kind: input, shape index: {}]   ;;  %s2248_s6 = inlined_call_operand.vmem [shape: f32[72,72], index: 6, kind: input, shape index: {}]   ;;  %s2249_s7 = inlined_call_operand.vmem [shape: f32[32,32], index: 7, kind: input, shape index: {}]   ;;  %s2250_s8 = inlined_call_operand.vmem [shape: f32[1,32], index: 8, kind: input, shape index: {}]   ;;  %s2251_s9 = inlined_call_operand.vmem [shape: f32[4,18,72], index: 9, kind: input, shape index: {}]   ;;  %s2252_s10 = inlined_call_operand.vmem [shape: f32[4,32,32], index: 10, kind: input, shape index: {}]   ;;  %s2253_s11 = inlined_call_operand.vmem [shape: f32[1,32], index: 11, kind: input, shape index: {}]   ;;  %s2254_s12 = inlined_call_operand.vmem [shape: f32[18,18], index: 12, kind: input, shape index: {}]   ;;  %s2255_s16 = inlined_call_operand.vmem [shape: f32[1,32], index: 16, kind: input, shape index: {}]   ;;  %s2256_s15 = inlined_call_operand.vmem [shape: f32[32,32], index: 15, kind: input, shape index: {}]   ;;  %s2257_s13 = inlined_call_operand.vmem [shape: f32[18,32], index: 13, kind: input, shape index: {}]   ;;  %s2258_s14 = inlined_call_operand.vmem [shape: f32[18,32], index: 14, kind: input, shape index: {}]   ;;  %s2259_s17 = inlined_call_operand.vmem [shape: f32[1,32], index: 17, kind: input, shape index: {}]   ;;  %s2260_s18 = inlined_call_operand.<no memory space> [shape: f32[1,1], index: 18, kind: input, shape index: {}]   ;;  %s2261_s19 = inlined_call_operand.vmem [shape: f32[18,1], index: 19, kind: output, shape index: {}]  }
   0x1   :  { %2264 = sst [smem:[#allocation3_spill]] %s2242_s1 }
   0x2   :  { %2265 = sst [smem:[#allocation4_spill]] %s2243_s0 }
   0x3   :  { %2266 = sst [smem:[#allocation5_spill]] %s2244_s2 }
   0x4   :  { %2267 = sst [smem:[#allocation6_spill]] %s2245_s3 }
   0x5   :  { %s2268_s20 = sld [smem:[#allocation3_spill]] }
   0x6   :  { %s2269_s22 = sld [smem:[#allocation4_spill]] }
   0x7   :  { %s2270_s3 = sld [smem:[#allocation5_spill]] }
   0x8   :  { %s2271_s27 = sld [smem:[#allocation6_spill]] }
   0xb   :  { %v73_v0 = vld [vmem:[%s2268_s20] sm:$0xff] }
   0xc   :  { %v64_v1 = vld [vmem:[%s2269_s22] sm:$0xff]  ;;  %121 = vmatpush.msra.mxu0 %v73_v0  ;;  %v65_v2 = vld [vmem:[%s2269_s22 + $0x8] sm:$0xff]  ;;  %v66_v3 = vld [vmem:[%s2269_s22 + $0x10] sm:$0xff] }
   0xd   :  { %1240 = vmatmul.msk.f32.vlgmr.msra.gmra.mxu0 %vm78_vm0, %v64_v1  ;;  %v67_v4 = vld [vmem:[%s2269_s22 + $0x18] sm:$0xff]  ;;  %v68_v5 = vld [vmem:[%s2269_s22 + $0x20] sm:$0xff]  ;;  %v69_v6 = vld [vmem:[%s2269_s22 + $0x28] sm:$0xff] }
   0xe   :  { %v70_v7 = vld [vmem:[%s2269_s22 + $0x30] sm:$0xff]  ;;  %v71_v8 = vld [vmem:[%s2269_s22 + $0x38] sm:$0xff]  ;;  %v72_v9 = vld [vmem:[%s2269_s22 + $0x40] sm:$0xff] }
   0xf   :  { %v1359_v10 = vld [vmem:[%s2270_s3] ss:$0 sm:$0xff]  ;;  %v1586_v39 = vld [vmem:[%s2271_s27 + $0x8] sm:$0xff]  ;;  %v1593_v40 = vld [vmem:[%s2271_s27 + $0x10] sm:$0xff] }
  0x10   :  { %v1577_v38 = vld [vmem:[%s2271_s27] sm:$0xff]  ;;  %v1600_v41 = vld [vmem:[%s2271_s27 + $0x18] sm:$0xff]  ;;  %v1614_v43 = vld [vmem:[%s2271_s27 + $0x28] sm:$0xff] }
  0x11   :  { %v1607_v42 = vld [vmem:[%s2271_s27 + $0x20] sm:$0xff]  ;;  %v1621_v44 = vld [vmem:[%s2271_s27 + $0x30] sm:$0xff]  ;;  %v1628_v45 = vld [vmem:[%s2271_s27 + $0x38] sm:$0xff] }
  0x12   :  { %v1635_v46 = vld [vmem:[%s2271_s27 + $0x40] sm:$0xff] }
  0x15   :  { %1241 = vmatmul.msk.f32.gmra.mxu0 %vm78_vm0, %v65_v2 }
  0x1d   :  { %1242 = vmatmul.msk.f32.gmra.mxu0 %vm78_vm0, %v66_v3 }
  0x25   :  { %1243 = vmatmul.msk.f32.gmra.mxu0 %vm78_vm0, %v67_v4 }
  0x2d   :  { %1244 = vmatmul.msk.f32.gmra.mxu0 %vm78_vm0, %v68_v5 }
  0x35   :  { %1245 = vmatmul.msk.f32.gmra.mxu0 %vm78_vm0, %v69_v6 }
  0x3d   :  { %1246 = vmatmul.msk.f32.gmra.mxu0 %vm78_vm0, %v70_v7 }
  0x45   :  { %1247 = vmatmul.msk.f32.gmra.mxu0 %vm78_vm0, %v71_v8 }
  0x4d   :  { %1248 = vmatmul.msk.f32.gmra.mxu0 %vm78_vm0, %v72_v9 }
  0x8a   :  { %v123_v11 = vpop.f32.mrf.mxu0 }
  0x8b   :  { %v1531_v12 = vadd.f32 %v1359_v10, %v123_v11 }
  0x8d   :  { %v150_v37 = vmax.f32 %v1531_v12, 0.0 }
  0x92   :  { %v126_v13 = vpop.f32.mrf.mxu0 }
  0x93   :  { %v1533_v14 = vadd.f32 %v1359_v10, %v126_v13 }
  0x95   :  { %v151_v36 = vmax.f32 %v1533_v14, 0.0 }
  0x9a   :  { %v129_v15 = vpop.f32.mrf.mxu0 }
  0x9b   :  { %v1557_v32 = vadd.f32 %v1359_v10, %v129_v15 }
  0x9d   :  { %v152_v35 = vmax.f32 %v1557_v32, 0.0 }
  0xa2   :  { %v132_v16 = vpop.f32.mrf.mxu0 }
  0xa3   :  { %v1552_v30 = vadd.f32 %v1359_v10, %v132_v16 }
  0xa5   :  { %v153_v34 = vmax.f32 %v1552_v30, 0.0 }
  0xaa   :  { %v135_v17 = vpop.f32.mrf.mxu0 }
  0xab   :  { %v1547_v28 = vadd.f32 %v1359_v10, %v135_v17 }
  0xad   :  { %v154_v33 = vmax.f32 %v1547_v28, 0.0 }
  0xb2   :  { %v138_v18 = vpop.f32.mrf.mxu0 }
  0xb3   :  { %v1542_v26 = vadd.f32 %v1359_v10, %v138_v18 }
  0xb5   :  { %v155_v31 = vmax.f32 %v1542_v26, 0.0 }
  0xba   :  { %v141_v19 = vpop.f32.mrf.mxu0 }
  0xbb   :  { %v1539_v24 = vadd.f32 %v1359_v10, %v141_v19 }
  0xbd   :  { %v156_v29 = vmax.f32 %v1539_v24, 0.0 }
  0xc2   :  { %v144_v20 = vpop.f32.mrf.mxu0 }
  0xc3   :  { %v1535_v22 = vadd.f32 %v1359_v10, %v144_v20 }
  0xc5   :  { %v157_v27 = vmax.f32 %v1535_v22, 0.0 }
  0xca   :  { %v147_v21 = vpop.f32.mrf.mxu0 }
  0xcb   :  { %v1537_v23 = vadd.f32 %v1359_v10, %v147_v21 }
  0xcd   :  { %v158_v25 = vmax.f32 %v1537_v23, 0.0 }
  0xcf   :  { %221 = vmatpush.msra.mxu1 %v158_v25 }
  0xd1   :  { %222 = vmatpush.msra.mxu1 %v157_v27 }
  0xd3   :  { %223 = vmatpush.msra.mxu1 %v156_v29 }
  0xd5   :  { %224 = vmatpush.msra.mxu1 %v155_v31 }
  0xd7   :  { %225 = vmatpush.msra.mxu1 %v154_v33 }
  0xd9   :  { %226 = vmatpush.msra.mxu1 %v153_v34 }
  0xdb   :  { %227 = vmatpush.msra.mxu1 %v152_v35 }
  0xdd   :  { %228 = vmatpush.msra.mxu1 %v151_v36 }
  0xdf   :  { %229 = vmatpush.msra.mxu1 %v150_v37 }
  0xe0   :  { %1249 = vmatmul.msk.f32.vlgmr.msra.gmra.mxu1 %vm186_vm1, %v1577_v38 }
  0xe8   :  { %1250 = vmatmul.msk.f32.gmra.mxu1 %vm186_vm1, %v1586_v39 }
  0xf0   :  { %1251 = vmatmul.msk.f32.gmra.mxu1 %vm186_vm1, %v1593_v40 }
  0xf8   :  { %1252 = vmatmul.msk.f32.gmra.mxu1 %vm186_vm1, %v1600_v41 }
 0x100   :  { %1253 = vmatmul.msk.f32.gmra.mxu1 %vm186_vm1, %v1607_v42 }
 0x108   :  { %1254 = vmatmul.msk.f32.gmra.mxu1 %vm186_vm1, %v1614_v43 }
 0x110   :  { %1255 = vmatmul.msk.f32.gmra.mxu1 %vm186_vm1, %v1621_v44 }
 0x118   :  { %1256 = vmatmul.msk.f32.gmra.mxu1 %vm186_vm1, %v1628_v45 }
 0x120   :  { %1257 = vmatmul.msk.f32.gmra.mxu1 %vm186_vm1, %v1635_v46 }
 0x15d   :  { %v231_v47 = vpop.f32.mrf.mxu1 }
 0x15e   :  { %v259_v56 = vsel %vm258_vm2, %v231_v47, 0.0 }
 0x165   :  { %v234_v48 = vpop.f32.mrf.mxu1 }
 0x166   :  { %v262_v61 = vsel %vm258_vm2, %v234_v48, 0.0 }
 0x16d   :  { %v237_v49 = vpop.f32.mrf.mxu1 }
 0x16e   :  { %v265_v0 = vsel %vm258_vm2, %v237_v49, 0.0 }
 0x175   :  { %v240_v50 = vpop.f32.mrf.mxu1 }
 0x176   :  { %v268_v54 = vsel %vm258_vm2, %v240_v50, 0.0 }
 0x17d   :  { %v243_v51 = vpop.f32.mrf.mxu1 }
 0x17e   :  { %v271_v52 = vsel %vm258_vm2, %v243_v51, 0.0 }
 0x17f   :  { %272 = vadd.xlane.f32.xlu2 %v271_v52 }
 0x185   :  { %v246_v53 = vpop.f32.mrf.mxu1 }
 0x186   :  { %v274_v59 = vsel %vm258_vm2, %v246_v53, 0.0 }
 0x187   :  { %269 = vadd.xlane.f32.xlu2 %v268_v54 }
 0x18d   :  { %v249_v55 = vpop.f32.mrf.mxu1 }
 0x18e   :  { %v277_v57 = vsel %vm258_vm2, %v249_v55, 0.0 }
 0x18f   :  { %260 = vadd.xlane.f32.xlu2 %v259_v56  ;;  %278 = vadd.xlane.f32.xlu1 %v277_v57 }
 0x195   :  { %v252_v58 = vpop.f32.mrf.mxu1 }
 0x196   :  { %v280_v63 = vsel %vm258_vm2, %v252_v58, 0.0 }
 0x197   :  { %275 = vadd.xlane.f32.xlu1 %v274_v59 }
 0x19d   :  { %v255_v60 = vpop.f32.mrf.mxu1 }
 0x19e   :  { %v283_v62 = vsel %vm258_vm2, %v255_v60, 0.0 }
 0x19f   :  { %263 = vadd.xlane.f32.xlu1 %v262_v61  ;;  %284 = vadd.xlane.f32.xlu0 %v283_v62 }
 0x1a7   :  { %281 = vadd.xlane.f32.xlu0 %v280_v63 }
 0x1af   :  { %266 = vadd.xlane.f32.xlu0 %v265_v0 }
 0x1f2   :  { %v273_v2 = vpop.xlane.xlu2 %272 }
 0x1f3   :  { %v290_v15 = vmul.f32 0.0034722222, %v273_v2 }
 0x1f5   :  { %v1670_v23 = vsub.f32 %v154_v33, %v290_v15 }
 0x1f7   :  { %v308_v33 = vmul.f32 %v1670_v23, %v1670_v23 }
 0x1fa   :  { %v270_v8 = vpop.xlane.xlu2 %269 }
 0x1fb   :  { %v289_v18 = vmul.f32 0.0034722222, %v270_v8 }
 0x202   :  { %v279_v1 = vpop.xlane.xlu1 %278  ;;  %v261_v22 = vpop.xlane.xlu2 %260 }
 0x203   :  { %v292_v9 = vmul.f32 0.0034722222, %v279_v1  ;;  %v286_v47 = vmul.f32 0.0034722222, %v261_v22 }
 0x205   :  { %v1656_v16 = vsub.f32 %v156_v29, %v292_v9  ;;  %v1694_v48 = vsub.f32 %v150_v37, %v286_v47 }
 0x207   :  { %v310_v24 = vmul.f32 %v1656_v16, %v1656_v16  ;;  %v304_v14 = vmul.f32 %v1694_v48, %v1694_v48 }
 0x20a   :  { %v276_v6 = vpop.xlane.xlu1 %275 }
 0x20b   :  { %v291_v11 = vmul.f32 0.0034722222, %v276_v6 }
 0x20d   :  { %v1664_v19 = vsub.f32 %v155_v31, %v291_v11 }
 0x20f   :  { %v309_v31 = vmul.f32 %v1664_v19, %v1664_v19 }
 0x212   :  { %v285_v3 = vpop.xlane.xlu0 %284  ;;  %v264_v21 = vpop.xlane.xlu1 %263 }
 0x213   :  { %v294_v4 = vmul.f32 0.0034722222, %v285_v3  ;;  %v287_v26 = vmul.f32 0.0034722222, %v264_v21 }
 0x215   :  { %v1650_v5 = vsub.f32 %v158_v25, %v294_v4  ;;  %v1688_v30 = vsub.f32 %v151_v36, %v287_v26 }
 0x217   :  { %v312_v7 = vmul.f32 %v1650_v5, %v1650_v5 }
 0x219   :  { %320 = vmatpush.msra.mxu2 %v312_v7 }
 0x21a   :  { %v282_v10 = vpop.xlane.xlu0 %281 }
 0x21b   :  { %v293_v13 = vmul.f32 0.0034722222, %v282_v10 }
 0x21d   :  { %v1660_v17 = vsub.f32 %v157_v27, %v293_v13  ;;  %v1676_v27 = vsub.f32 %v153_v34, %v289_v18 }
 0x21f   :  { %v311_v20 = vmul.f32 %v1660_v17, %v1660_v17  ;;  %v307_v34 = vmul.f32 %v1676_v27, %v1676_v27 }
 0x221   :  { %321 = vmatpush.msra.mxu2 %v311_v20 }
 0x222   :  { %v267_v25 = vpop.xlane.xlu0 %266 }
 0x223   :  { %v288_v29 = vmul.f32 0.0034722222, %v267_v25  ;;  %322 = vmatpush.msra.mxu2 %v310_v24 }
 0x225   :  { %v1682_v28 = vsub.f32 %v152_v35, %v288_v29  ;;  %323 = vmatpush.msra.mxu2 %v309_v31  ;;  %v305_v35 = vmul.f32 %v1688_v30, %v1688_v30 }
 0x227   :  { %324 = vmatpush.msra.mxu2 %v308_v33  ;;  %v306_v32 = vmul.f32 %v1682_v28, %v1682_v28 }
 0x229   :  { %325 = vmatpush.msra.mxu2 %v307_v34 }
 0x22b   :  { %326 = vmatpush.msra.mxu2 %v306_v32 }
 0x22d   :  { %327 = vmatpush.msra.mxu2 %v305_v35 }
 0x22f   :  { %328 = vmatpush.msra.mxu2 %v304_v14 }
 0x230   :  { %1258 = vmatmul.msk.f32.vlgmr.msra.gmra.mxu2 %vm186_vm1, %v1577_v38 }
 0x238   :  { %1259 = vmatmul.msk.f32.gmra.mxu2 %vm186_vm1, %v1586_v39 }
 0x240   :  { %1260 = vmatmul.msk.f32.gmra.mxu2 %vm186_vm1, %v1593_v40 }
 0x248   :  { %1261 = vmatmul.msk.f32.gmra.mxu2 %vm186_vm1, %v1600_v41 }
 0x250   :  { %1262 = vmatmul.msk.f32.gmra.mxu2 %vm186_vm1, %v1607_v42 }
 0x258   :  { %1263 = vmatmul.msk.f32.gmra.mxu2 %vm186_vm1, %v1614_v43 }
 0x260   :  { %1264 = vmatmul.msk.f32.gmra.mxu2 %vm186_vm1, %v1621_v44 }
 0x268   :  { %1265 = vmatmul.msk.f32.gmra.mxu2 %vm186_vm1, %v1628_v45 }
 0x270   :  { %1266 = vmatmul.msk.f32.gmra.mxu2 %vm186_vm1, %v1635_v46 }
 0x2b3   :  { %v330_v12 = vpop.f32.mrf.mxu2 }
 0x2b4   :  { %v357_v46 = vsel %vm258_vm2, %v330_v12, 0.0 }
 0x2bb   :  { %v333_v36 = vpop.f32.mrf.mxu2 }
 0x2bc   :  { %v360_v52 = vsel %vm258_vm2, %v333_v36, 0.0 }
 0x2c3   :  { %v336_v37 = vpop.f32.mrf.mxu2 }
 0x2c4   :  { %v363_v54 = vsel %vm258_vm2, %v336_v37, 0.0 }
 0x2cb   :  { %v339_v38 = vpop.f32.mrf.mxu2 }
 0x2cc   :  { %v366_v49 = vsel %vm258_vm2, %v339_v38, 0.0 }
 0x2d3   :  { %v342_v39 = vpop.f32.mrf.mxu2 }
 0x2d4   :  { %v369_v50 = vsel %vm258_vm2, %v342_v39, 0.0 }
 0x2db   :  { %v345_v40 = vpop.f32.mrf.mxu2 }
 0x2dc   :  { %v372_v53 = vsel %vm258_vm2, %v345_v40, 0.0 }
 0x2e3   :  { %v348_v41 = vpop.f32.mrf.mxu2 }
 0x2e4   :  { %v375_v42 = vsel %vm258_vm2, %v348_v41, 0.0 }
 0x2e5   :  { %376 = vadd.xlane.f32.xlu2 %v375_v42 }
 0x2eb   :  { %v351_v43 = vpop.f32.mrf.mxu2 }
 0x2ec   :  { %v378_v44 = vsel %vm258_vm2, %v351_v43, 0.0 }
 0x2ed   :  { %367 = vadd.xlane.f32.xlu2 %v366_v49  ;;  %379 = vadd.xlane.f32.xlu1 %v378_v44 }
 0x2f3   :  { %v354_v45 = vpop.f32.mrf.mxu2 }
 0x2f4   :  { %v381_v51 = vsel %vm258_vm2, %v354_v45, 0.0 }
 0x2f5   :  { %358 = vadd.xlane.f32.xlu2 %v357_v46  ;;  %370 = vadd.xlane.f32.xlu1 %v369_v50 }
 0x2f6   :  { %382 = vadd.xlane.f32.xlu0 %v381_v51 }
 0x2fd   :  { %361 = vadd.xlane.f32.xlu1 %v360_v52 }
 0x2fe   :  { %373 = vadd.xlane.f32.xlu0 %v372_v53 }
 0x306   :  { %364 = vadd.xlane.f32.xlu0 %v363_v54  ;;  %v182_v54 = vld [vmem:[%s2247_s5 + $0x28] sm:$0xff] }
 0x358   :  { %v377_v55 = vpop.xlane.xlu2 %376 }
 0x359   :  { %v390_v56 = vmul.f32 0.0034722222, %v377_v55 }
 0x35b   :  { %v1729_v57 = vadd.f32 1e-05, %v390_v56 }
 0x35d   :  { %1365 = vrsqrt.f32 %v1729_v57  ;;  %vm468_vm6 = vweird.f32 %v1729_v57 }
 0x360   :  { %v368_v58 = vpop.xlane.xlu2 %367  ;;  %v380_v59 = vpop.xlane.xlu1 %379 }
 0x361   :  { %v387_v60 = vmul.f32 0.0034722222, %v368_v58  ;;  %v391_v61 = vmul.f32 0.0034722222, %v380_v59 }
 0x363   :  { %v400_v62 = vadd.f32 1e-05, %v391_v61  ;;  %v1732_v63 = vadd.f32 1e-05, %v387_v60  ;;  %v1734_v0 = vpop.eup %1365 }
 0x364   :  { %v463_v1 = vmul.f32 %v1734_v0, %v1729_v57  ;;  %vm469_vm4 = vweird.f32 %v1734_v0 }
 0x365   :  { %1367 = vrsqrt.f32 %v400_v62  ;;  %vm478_vm5 = vweird.f32 %v400_v62  ;;  %vm1781_vm9 = vmor %vm468_vm6, %vm469_vm4  ;;  %vm438_vm15 = vweird.f32 %v1732_v63 }
 0x366   :  { %1369 = vrsqrt.f32 %v1732_v63  ;;  %v464_v11 = vmul.f32 %v1734_v0, %v463_v1 }
 0x368   :  { %v359_v2 = vpop.xlane.xlu2 %358  ;;  %v371_v3 = vpop.xlane.xlu1 %370  ;;  %v465_v24 = vmul.f32 0.5, %v464_v11 }
 0x369   :  { %v384_v4 = vmul.f32 0.0034722222, %v359_v2  ;;  %v388_v6 = vmul.f32 0.0034722222, %v371_v3  ;;  %v383_v7 = vpop.xlane.xlu0 %382 }
 0x36a   :  { %v392_v8 = vmul.f32 0.0034722222, %v383_v7  ;;  %v466_v12 = vsub.f32 1.5, %v465_v24 }
 0x36b   :  { %v1739_v9 = vadd.f32 1e-05, %v388_v6  ;;  %v1741_v10 = vpop.eup %1367  ;;  %v1745_v18 = vadd.f32 1e-05, %v384_v4 }
 0x36c   :  { %v401_v13 = vadd.f32 1e-05, %v392_v8  ;;  %v473_v15 = vmul.f32 %v1741_v10, %v400_v62  ;;  %v1747_v20 = vpop.eup %1369  ;;  %vm479_vm3 = vweird.f32 %v1741_v10  ;;  %v467_v43 = vmul.f32 %v1734_v0, %v466_v12 }
 0x36d   :  { %1371 = vrsqrt.f32 %v1739_v9  ;;  %v433_v25 = vmul.f32 %v1747_v20, %v1732_v63  ;;  %vm1777_vm7 = vmor %vm478_vm5, %vm479_vm3  ;;  %vm439_vm13 = vweird.f32 %v1747_v20  ;;  %vm448_vm14 = vweird.f32 %v1739_v9 }
 0x36e   :  { %v474_v21 = vmul.f32 %v1741_v10, %v473_v15  ;;  %1373 = vrsqrt.f32 %v401_v13  ;;  %vm488_vm10 = vweird.f32 %v401_v13  ;;  %v471_v62 = vsel %vm1781_vm9, %v1734_v0, %v467_v43  ;;  %v176_v0 = vld [vmem:[%s2246_s4 + $0x40] sm:$0xff]  ;;  %vm1835_vm4 = vmor %vm438_vm15, %vm439_vm13 }
 0x36f   :  { %1375 = vrsqrt.f32 %v1745_v18  ;;  %v434_v36 = vmul.f32 %v1747_v20, %v433_v25  ;;  %v185_v25 = vld [vmem:[%s2247_s5 + $0x40] sm:$0xff] }
 0x370   :  { %v362_v22 = vpop.xlane.xlu1 %361  ;;  %v475_v26 = vmul.f32 0.5, %v474_v21  ;;  %v498_v21 = vmul.f32 %v471_v62, %v1656_v16 }
 0x371   :  { %v385_v29 = vmul.f32 0.0034722222, %v362_v22  ;;  %v374_v31 = vpop.xlane.xlu0 %373  ;;  %v435_v49 = vmul.f32 0.5, %v434_v36 }
 0x372   :  { %v389_v47 = vmul.f32 0.0034722222, %v374_v31  ;;  %v476_v32 = vsub.f32 1.5, %v475_v26  ;;  %v174_v26 = vld [vmem:[%s2246_s4 + $0x30] sm:$0xff] }
 0x373   :  { %v1754_v33 = vadd.f32 1e-05, %v385_v29  ;;  %v1756_v34 = vpop.eup %1371  ;;  %v436_v57 = vsub.f32 1.5, %v435_v49  ;;  %v507_v36 = vmul.f32 %v498_v21, %v174_v26  ;;  %v522_v26 = vld [vmem:[%s2248_s6 + $0x18] sm:$0xff] }
 0x374   :  { %v1758_v35 = vadd.f32 1e-05, %v389_v47  ;;  %v1374_v14 = vpop.eup %1373  ;;  %v443_v37 = vmul.f32 %v1756_v34, %v1739_v9  ;;  %v477_v41 = vmul.f32 %v1741_v10, %v476_v32  ;;  %vm449_vm11 = vweird.f32 %v1756_v34  ;;  %v184_v47 = vld [vmem:[%s2247_s5 + $0x38] sm:$0xff] }
 0x375   :  { %1377 = vrsqrt.f32 %v1754_v33  ;;  %v483_v38 = vmul.f32 %v1374_v14, %v401_v13  ;;  %v1764_v39 = vpop.eup %1375  ;;  %vm489_vm8 = vweird.f32 %v1374_v14  ;;  %v175_v13 = vld [vmem:[%s2246_s4 + $0x38] sm:$0xff]  ;;  %vm1823_vm0 = vmor %vm448_vm14, %vm449_vm11  ;;  %vm418_vm9 = vweird.f32 %v1754_v33 }
 0x376   :  { %v444_v40 = vmul.f32 %v1756_v34, %v443_v37  ;;  %1379 = vrsqrt.f32 %v1758_v35  ;;  %v403_v46 = vmul.f32 %v1764_v39, %v1745_v18  ;;  %v481_v59 = vsel %vm1777_vm7, %v1741_v10, %v477_v41  ;;  %vm490_vm12 = vmor %vm488_vm10, %vm489_vm8  ;;  %v183_v41 = vld [vmem:[%s2247_s5 + $0x30] sm:$0xff] }
 0x377   :  { %v484_v42 = vmul.f32 %v1374_v14, %v483_v38  ;;  %v499_v6 = vmul.f32 %v481_v59, %v1660_v17  ;;  %v437_v17 = vmul.f32 %v1747_v20, %v436_v57  ;;  %vm458_vm5 = vweird.f32 %v1758_v35 }
 0x378   :  { %v445_v44 = vmul.f32 0.5, %v444_v40  ;;  %v404_v1 = vmul.f32 %v1764_v39, %v403_v46  ;;  %v172_v46 = vld [vmem:[%s2246_s4 + $0x20] sm:$0xff]  ;;  %vm409_vm8 = vweird.f32 %v1764_v39  ;;  %vm408_vm11 = vweird.f32 %v1745_v18  ;;  %v180_v18 = vld [vmem:[%s2247_s5 + $0x18] sm:$0xff] }
 0x379   :  { %v365_v45 = vpop.xlane.xlu0 %364  ;;  %v485_v50 = vmul.f32 0.5, %v484_v42  ;;  %v508_v29 = vmul.f32 %v499_v6, %v175_v13  ;;  %vm1880_vm13 = vmor %vm408_vm11, %vm409_vm8  ;;  %v178_v13 = vld [vmem:[%s2247_s5 + $0x8] sm:$0xff] }
 0x37a   :  { %v386_v51 = vmul.f32 0.0034722222, %v365_v45  ;;  %v446_v55 = vsub.f32 1.5, %v445_v44  ;;  %v405_v24 = vmul.f32 0.5, %v404_v1  ;;  %v173_v44 = vld [vmem:[%s2246_s4 + $0x28] sm:$0xff] }
 0x37b   :  { %v1774_v52 = vpop.eup %1377  ;;  %v486_v56 = vsub.f32 1.5, %v485_v50  ;;  %v517_v42 = vadd.f32 %v508_v29, %v184_v47  ;;  %v601_v29 = vld [vmem:[%s2249_s7 + $0x10] sm:$0xff] }
 0x37c   :  { %v413_v58 = vmul.f32 %v1774_v52, %v1754_v33  ;;  %v1380_v60 = vpop.eup %1379  ;;  %v1790_v61 = vadd.f32 1e-05, %v386_v51  ;;  %v447_v7 = vmul.f32 %v1756_v34, %v446_v55  ;;  %v406_v37 = vsub.f32 1.5, %v405_v24  ;;  %v171_v55 = vld [vmem:[%s2246_s4 + $0x18] sm:$0xff]  ;;  %v519_v24 = vld [vmem:[%s2248_s6] sm:$0xff]  ;;  %v525_v47 = vld [vmem:[%s2248_s6 + $0x30] sm:$0xff] }
 0x37d   :  { %v453_v3 = vmul.f32 %v1380_v60, %v1758_v35  ;;  %v487_v4 = vmul.f32 %v1374_v14, %v486_v56  ;;  %vm459_vm3 = vweird.f32 %v1380_v60  ;;  %vm419_vm7 = vweird.f32 %v1774_v52 }
 0x37e   :  { %v414_v2 = vmul.f32 %v1774_v52, %v413_v58  ;;  %1381 = vrsqrt.f32 %v1790_v61  ;;  %v451_v32 = vsel %vm1823_vm0, %v1756_v34, %v447_v7  ;;  %v441_v34 = vsel %vm1835_vm4, %v1747_v20, %v437_v17  ;;  %vm460_vm6 = vmor %vm458_vm5, %vm459_vm3  ;;  %v181_v58 = vld [vmem:[%s2247_s5 + $0x20] sm:$0xff] }
 0x37f   :  { %v454_v10 = vmul.f32 %v1380_v60, %v453_v3  ;;  %v491_v11 = vsel %vm490_vm12, %v1374_v14, %v487_v4  ;;  %v496_v43 = vmul.f32 %v451_v32, %v1670_v23  ;;  %v516_v20 = vadd.f32 %v507_v36, %v183_v41  ;;  %vm1869_vm10 = vmor %vm418_vm9, %vm419_vm7  ;;  %v170_v4 = vld [vmem:[%s2246_s4 + $0x10] sm:$0xff]  ;;  %v526_v32 = vld [vmem:[%s2248_s6 + $0x38] sm:$0xff] }
 0x380   :  { %v415_v8 = vmul.f32 0.5, %v414_v2  ;;  %v500_v15 = vmul.f32 %v491_v11, %v1650_v5  ;;  %v495_v23 = vmul.f32 %v441_v34, %v1676_v27  ;;  %v407_v51 = vmul.f32 %v1764_v39, %v406_v37  ;;  %v523_v5 = vld [vmem:[%s2248_s6 + $0x20] sm:$0xff] }
 0x381   :  { %v455_v22 = vmul.f32 0.5, %v454_v10  ;;  %v505_v56 = vmul.f32 %v496_v43, %v172_v46  ;;  %vm428_vm14 = vweird.f32 %v1790_v61  ;;  %v179_v10 = vld [vmem:[%s2247_s5 + $0x10] sm:$0xff]  ;;  %v599_v14 = vld [vmem:[%s2249_s7] sm:$0xff]  ;;  %vm1023_vm0 = vcmask 146432  }
 0x382   :  { %v509_v16 = vmul.f32 %v500_v15, %v176_v0  ;;  %v416_v9 = vsub.f32 1.5, %v415_v8  ;;  %v504_v62 = vmul.f32 %v495_v23, %v171_v55  ;;  %v411_v2 = vsel %vm1880_vm13, %v1764_v39, %v407_v51  ;;  %v1360_v51 = vld [vmem:[%s2250_s8] ss:$0 sm:$0xff] }
 0x383   :  { %v456_v31 = vsub.f32 1.5, %v455_v22  ;;  %v492_v39 = vmul.f32 %v411_v2, %v1694_v48  ;;  %v520_v22 = vld [vmem:[%s2248_s6 + $0x8] sm:$0xff]  ;;  %vm1069_vm3 = vcmask 254976   ;;  %vm1231_vm13 = vcmask 7168  }
 0x384   :  { %v1382_v63 = vpop.eup %1381  ;;  %v518_v12 = vadd.f32 %v509_v16, %v185_v25  ;;  %v417_v35 = vmul.f32 %v1774_v52, %v416_v9  ;;  %v513_v7 = vadd.f32 %v504_v62, %v180_v18  ;;  %v521_v25 = vld [vmem:[%s2248_s6 + $0x10] sm:$0xff]  ;;  %v602_v16 = vld [vmem:[%s2249_s7 + $0x18] sm:$0xff]  ;;  %v600_v9 = vld [vmem:[%s2249_s7 + $0x8] sm:$0xff] }
 0x385   :  { %v457_v38 = vmul.f32 %v1380_v60, %v456_v31  ;;  %v423_v40 = vmul.f32 %v1382_v63, %v1790_v61  ;;  %vm429_vm12 = vweird.f32 %v1382_v63  ;;  %v169_v61 = vld [vmem:[%s2246_s4 + $0x8] sm:$0xff]  ;;  %646 = vmatpush.msrb.mxu0 %v602_v16 }
 0x386   :  { %562 = vmatpush.msra.mxu3 %v518_v12  ;;  %v421_v59 = vsel %vm1869_vm10, %v1774_v52, %v417_v35  ;;  %vm430_vm15 = vmor %vm428_vm14, %vm429_vm12  ;;  %v514_v52 = vadd.f32 %v505_v56, %v181_v58  ;;  %v524_v31 = vld [vmem:[%s2248_s6 + $0x28] sm:$0xff] }
 0x387   :  { %v424_v49 = vmul.f32 %v1382_v63, %v423_v40  ;;  %v461_v45 = vsel %vm460_vm6, %v1380_v60, %v457_v38  ;;  %v493_v3 = vmul.f32 %v421_v59, %v1688_v30  ;;  %v168_v30 = vld [vmem:[%s2246_s4] sm:$0xff]  ;;  %647 = vmatpush.msrb.mxu0 %v601_v29  ;;  %v1311_v16 = vld [vmem:[%s2252_s10 + $0x48] sm:$0xff] }
 0x388   :  { %563 = vmatpush.msra.mxu3 %v517_v42  ;;  %v497_v50 = vmul.f32 %v461_v45, %v1664_v19  ;;  %v501_v21 = vmul.f32 %v492_v39, %v168_v30  ;;  %v727_v39 = vld [vmem:[%s2252_s10 + $0x10] sm:$0xff]  ;;  %v725_v30 = vld [vmem:[%s2252_s10] sm:$0xff] }
 0x389   :  { %v425_v53 = vmul.f32 0.5, %v424_v49  ;;  %v502_v11 = vmul.f32 %v493_v3, %v169_v61  ;;  %648 = vmatpush.msrb.mxu0 %v600_v9  ;;  %v687_v61 = vld [vmem:[%s2251_s9] sm:$0xff]  ;;  %v1318_v9 = vld [vmem:[%s2251_s9 + $0x50] sm:$0xff] }
 0x38a   :  { %564 = vmatpush.msra.mxu3 %v516_v20  ;;  %v506_v27 = vmul.f32 %v497_v50, %v173_v44  ;;  %v1310_v29 = vld [vmem:[%s2252_s10 + $0x40] sm:$0xff] }
 0x38b   :  { %v426_v33 = vsub.f32 1.5, %v425_v53  ;;  %v511_v48 = vadd.f32 %v502_v11, %v178_v13  ;;  %649 = vmatpush.msrb.mxu0 %v599_v14  ;;  %v688_v11 = vld [vmem:[%s2251_s9 + $0x8] sm:$0xff]  ;;  %v1297_v13 = vld [vmem:[%s2252_s10 + $0x38] sm:$0xff] }
 0x38c   :  { %v515_v57 = vadd.f32 %v506_v27, %v182_v54 }
 0x38d   :  { %v427_v1 = vmul.f32 %v1382_v63, %v426_v33 }
 0x38e   :  { %565 = vmatpush.msra.mxu3 %v515_v57 }
 0x38f   :  { %v431_v6 = vsel %vm430_vm15, %v1382_v63, %v427_v1  ;;  %v527_v63 = vld [vmem:[%s2248_s6 + $0x40] sm:$0xff] }
 0x390   :  { %566 = vmatpush.msra.mxu3 %v514_v52  ;;  %v494_v8 = vmul.f32 %v431_v6, %v1682_v28  ;;  %v177_v28 = vld [vmem:[%s2247_s5] sm:$0xff] }
 0x391   :  { %v510_v17 = vadd.f32 %v501_v21, %v177_v28  ;;  %v1295_v21 = vld [vmem:[%s2252_s10 + $0x28] sm:$0xff] }
 0x392   :  { %567 = vmatpush.msra.mxu3 %v513_v7  ;;  %v503_v0 = vmul.f32 %v494_v8, %v170_v4  ;;  %v1288_v7 = vld [vmem:[%s2251_s9 + $0x18] sm:$0xff]  ;;  %v1290_v28 = vld [vmem:[%s2251_s9 + $0x28] sm:$0x3] }
 0x393   :  { %v728_v8 = vld [vmem:[%s2252_s10 + $0x18] sm:$0xff] }
 0x394   :  { %v512_v15 = vadd.f32 %v503_v0, %v179_v10  ;;  %v726_v10 = vld [vmem:[%s2252_s10 + $0x8] sm:$0xff]  ;;  %v1289_v0 = vld [vmem:[%s2251_s9 + $0x20] sm:$0xff] }
 0x396   :  { %568 = vmatpush.msra.mxu3 %v512_v15  ;;  %v1296_v15 = vld [vmem:[%s2252_s10 + $0x30] sm:$0xff] }
 0x398   :  { %569 = vmatpush.msra.mxu3 %v511_v48  ;;  %v689_v48 = vld [vmem:[%s2251_s9 + $0x10] sm:$0x3] }
 0x39a   :  { %570 = vmatpush.msra.mxu3 %v510_v17  ;;  %v1294_v17 = vld [vmem:[%s2252_s10 + $0x20] sm:$0xff] }
 0x39b   :  { %1267 = vmatmul.msk.f32.vlgmr.msra.gmra.mxu3 %vm186_vm1, %v519_v24  ;;  %v1304_v24 = vld [vmem:[%s2251_s9 + $0x30] sm:$0xff] }
 0x39c   :  { %794 = vmatpush.msrb.mxu3 %v1297_v13 }
 0x39e   :  { %795 = vmatpush.msrb.mxu3 %v1296_v15 }
 0x3a0   :  { %796 = vmatpush.msrb.mxu3 %v1295_v21 }
 0x3a2   :  { %797 = vmatpush.msrb.mxu3 %v1294_v17 }
 0x3a3   :  { %1268 = vmatmul.msk.f32.gmra.mxu3 %vm186_vm1, %v520_v22  ;;  %v1305_v22 = vld [vmem:[%s2251_s9 + $0x38] sm:$0xff] }
 0x3ab   :  { %1269 = vmatmul.msk.f32.gmra.mxu3 %vm186_vm1, %v521_v25  ;;  %v1306_v25 = vld [vmem:[%s2251_s9 + $0x40] sm:$0x3] }
 0x3b3   :  { %1270 = vmatmul.msk.f32.gmra.mxu3 %vm186_vm1, %v522_v26  ;;  %v1313_v26 = vld [vmem:[%s2252_s10 + $0x58] sm:$0xff] }
 0x3b4   :  { %908 = vmatpush.msra.mxu3 %v1313_v26 }
 0x3bb   :  { %1271 = vmatmul.msk.f32.gmra.mxu3 %vm186_vm1, %v523_v5  ;;  %v1312_v5 = vld [vmem:[%s2252_s10 + $0x50] sm:$0xff] }
 0x3bc   :  { %909 = vmatpush.msra.mxu3 %v1312_v5 }
 0x3be   :  { %910 = vmatpush.msra.mxu3 %v1311_v16 }
 0x3c0   :  { %911 = vmatpush.msra.mxu3 %v1310_v29 }
 0x3c3   :  { %1272 = vmatmul.msk.f32.gmra.mxu3 %vm186_vm1, %v524_v31 }
 0x3cb   :  { %1273 = vmatmul.msk.f32.gmra.mxu3 %vm186_vm1, %v525_v47 }
 0x3d3   :  { %1274 = vmatmul.msk.f32.gmra.mxu3 %vm186_vm1, %v526_v32 }
 0x3db   :  { %1275 = vmatmul.msk.f32.gmra.mxu3 %vm186_vm1, %v527_v63 }
 0x41e   :  { %v572_v12 = vpop.f32.mrf.mxu3 }
 0x41f   :  { %1276 = vmatmul.msk.f32.vlgmr.msrb.gmra.mxu0 %vm258_vm2, %v572_v12 }
 0x426   :  { %v575_v36 = vpop.f32.mrf.mxu3 }
 0x427   :  { %1277 = vmatmul.msk.f32.gmra.mxu0 %vm258_vm2, %v575_v36  ;;  %v1317_v36 = vld [vmem:[%s2251_s9 + $0x48] sm:$0xff] }
 0x42e   :  { %v578_v37 = vpop.f32.mrf.mxu3 }
 0x42f   :  { %1278 = vmatmul.msk.f32.gmra.mxu0 %vm258_vm2, %v578_v37 }
 0x436   :  { %v581_v38 = vpop.f32.mrf.mxu3 }
 0x437   :  { %1279 = vmatmul.msk.f32.gmra.mxu0 %vm258_vm2, %v581_v38 }
 0x43e   :  { %v584_v40 = vpop.f32.mrf.mxu3 }
 0x43f   :  { %1280 = vmatmul.msk.f32.gmra.mxu0 %vm258_vm2, %v584_v40 }
 0x446   :  { %v587_v41 = vpop.f32.mrf.mxu3 }
 0x447   :  { %1281 = vmatmul.msk.f32.gmra.mxu0 %vm258_vm2, %v587_v41  ;;  %v1319_v41 = vld [vmem:[%s2251_s9 + $0x58] sm:$0x3] }
 0x44e   :  { %v590_v34 = vpop.f32.mrf.mxu3 }
 0x44f   :  { %1282 = vmatmul.msk.f32.gmra.mxu0 %vm258_vm2, %v590_v34  ;;  %v1326_v34 = vld [vmem:[%s2252_s10 + $0x78] sm:$0xff] }
 0x456   :  { %v593_v42 = vpop.f32.mrf.mxu3 }
 0x457   :  { %1283 = vmatmul.msk.f32.gmra.mxu0 %vm258_vm2, %v593_v42  ;;  %v1325_v42 = vld [vmem:[%s2252_s10 + $0x70] sm:$0xff] }
 0x45e   :  { %v596_v43 = vpop.f32.mrf.mxu3 }
 0x45f   :  { %1284 = vmatmul.msk.f32.gmra.mxu0 %vm258_vm2, %v596_v43  ;;  %v1324_v43 = vld [vmem:[%s2252_s10 + $0x68] sm:$0xff] }
 0x49c   :  { %v651_v35 = vpop.f32.mrf.mxu0 }
 0x49d   :  { %v652_v52 = vadd.f32 %v1360_v51, %v651_v35  ;;  %v1323_v35 = vld [vmem:[%s2252_s10 + $0x60] sm:$0xff] }
 0x49f   :  { %v2002_v6 = vmax.f32 %v652_v52, 0.0 }
 0x4a4   :  { %v654_v49 = vpop.f32.mrf.mxu0 }
 0x4a5   :  { %v655_v18 = vadd.f32 %v1360_v51, %v654_v49 }
 0x4a7   :  { %v1998_v4 = vmax.f32 %v655_v18, 0.0  ;;  %v1361_v18 = vld [vmem:[%s2253_s11] ss:$0 sm:$0xff] }
 0x4ac   :  { %v657_v44 = vpop.f32.mrf.mxu0 }
 0x4ad   :  { %v658_v62 = vadd.f32 %v1360_v51, %v657_v44 }
 0x4af   :  { %v1994_v3 = vmax.f32 %v658_v62, 0.0 }
 0x4b4   :  { %v660_v45 = vpop.f32.mrf.mxu0 }
 0x4b5   :  { %v661_v60 = vadd.f32 %v1360_v51, %v660_v45 }
 0x4b7   :  { %v1990_v2 = vmax.f32 %v661_v60, 0.0 }
 0x4bc   :  { %v663_v46 = vpop.f32.mrf.mxu0 }
 0x4bd   :  { %v664_v58 = vadd.f32 %v1360_v51, %v663_v46 }
 0x4bf   :  { %v1986_v1 = vmax.f32 %v664_v58, 0.0 }
 0x4c4   :  { %v666_v20 = vpop.f32.mrf.mxu0 }
 0x4c5   :  { %v667_v56 = vadd.f32 %v1360_v51, %v666_v20 }
 0x4c7   :  { %v1982_v57 = vmax.f32 %v667_v56, 0.0 }
 0x4cc   :  { %v669_v50 = vpop.f32.mrf.mxu0 }
 0x4cd   :  { %v670_v19 = vadd.f32 %v1360_v51, %v669_v50 }
 0x4cf   :  { %v1978_v59 = vmax.f32 %v670_v19, 0.0 }
 0x4d4   :  { %v672_v23 = vpop.f32.mrf.mxu0 }
 0x4d5   :  { %v673_v54 = vadd.f32 %v1360_v51, %v672_v23 }
 0x4d7   :  { %v1974_v33 = vmax.f32 %v673_v54, 0.0 }
 0x4dc   :  { %v675_v53 = vpop.f32.mrf.mxu0 }
 0x4dd   :  { %v676_v55 = vadd.f32 %v1360_v51, %v675_v53 }
 0x4df   :  { %v1972_v27 = vmax.f32 %v676_v55, 0.0 }
 0x4e1   :  { %706 = vmatpush.msrb.mxu1 %v1972_v27  ;;  %749 = vmatpush.msrb.mxu2 %v1972_v27 }
 0x4e3   :  { %707 = vmatpush.msrb.mxu1 %v1974_v33  ;;  %750 = vmatpush.msrb.mxu2 %v1974_v33 }
 0x4e5   :  { %708 = vmatpush.msrb.mxu1 %v1978_v59  ;;  %751 = vmatpush.msrb.mxu2 %v1978_v59 }
 0x4e7   :  { %709 = vmatpush.msrb.mxu1 %v1982_v57  ;;  %752 = vmatpush.msrb.mxu2 %v1982_v57 }
 0x4e9   :  { %710 = vmatpush.msrb.mxu1 %v1986_v1  ;;  %753 = vmatpush.msrb.mxu2 %v1986_v1 }
 0x4eb   :  { %711 = vmatpush.msrb.mxu1 %v1990_v2  ;;  %754 = vmatpush.msrb.mxu2 %v1990_v2 }
 0x4ed   :  { %712 = vmatpush.msrb.mxu1 %v1994_v3  ;;  %755 = vmatpush.msrb.mxu2 %v1994_v3 }
 0x4ef   :  { %713 = vmatpush.msrb.mxu1 %v1998_v4  ;;  %756 = vmatpush.msrb.mxu2 %v1998_v4 }
 0x4f1   :  { %714 = vmatpush.msrb.mxu1 %v2002_v6  ;;  %757 = vmatpush.msrb.mxu2 %v2002_v6 }
 0x4f2   :  { %1285 = vmatmul.msk.f32.vlgmr.msrb.gmra.mxu1 %vm186_vm1, %v687_v61  ;;  %1291 = vmatmul.msk.f32.vlgmr.msrb.gmra.mxu2 %vm186_vm1, %v1288_v7  ;;  %v1014_v7 = vld [vmem:[%s2254_s12] sm:$0xff] }
 0x4f3   :  { %829 = vmatpush.msra.mxu1 %v728_v8  ;;  %863 = vmatpush.msra.mxu2 %v1972_v27  ;;  %v1015_v8 = vld [vmem:[%s2254_s12 + $0x8] sm:$0xff] }
 0x4f5   :  { %830 = vmatpush.msra.mxu1 %v727_v39  ;;  %864 = vmatpush.msra.mxu2 %v1974_v33  ;;  %v1016_v39 = vld [vmem:[%s2254_s12 + $0x10] sm:$0x3] }
 0x4f7   :  { %831 = vmatpush.msra.mxu1 %v726_v10  ;;  %865 = vmatpush.msra.mxu2 %v1978_v59 }
 0x4f9   :  { %832 = vmatpush.msra.mxu1 %v725_v30  ;;  %866 = vmatpush.msra.mxu2 %v1982_v57 }
 0x4fa   :  { %1292 = vmatmul.msk.f32.gmra.mxu2 %vm186_vm1, %v1289_v0  ;;  %1286 = vmatmul.msk.f32.gmra.mxu1 %vm186_vm1, %v688_v11 }
 0x4fb   :  { %945 = vmatpush.msrb.mxu1 %v1972_v27  ;;  %867 = vmatpush.msra.mxu2 %v1986_v1 }
 0x4fd   :  { %946 = vmatpush.msrb.mxu1 %v1974_v33  ;;  %868 = vmatpush.msra.mxu2 %v1990_v2 }
 0x4ff   :  { %947 = vmatpush.msrb.mxu1 %v1978_v59  ;;  %869 = vmatpush.msra.mxu2 %v1994_v3 }
 0x501   :  { %948 = vmatpush.msrb.mxu1 %v1982_v57  ;;  %870 = vmatpush.msra.mxu2 %v1998_v4 }
 0x502   :  { %1293 = vmatmul.msk.f32.gmra.mxu2 %vm186_vm1, %v1290_v28  ;;  %1287 = vmatmul.msk.f32.gmra.mxu1 %vm186_vm1, %v689_v48 }
 0x503   :  { %949 = vmatpush.msrb.mxu1 %v1986_v1  ;;  %871 = vmatpush.msra.mxu2 %v2002_v6 }
 0x505   :  { %1341 = vmatpush.msrb.mxu2 %v1972_v27  ;;  %950 = vmatpush.msrb.mxu1 %v1990_v2 }
 0x507   :  { %1343 = vmatpush.msrb.mxu2 %v1974_v33  ;;  %951 = vmatpush.msrb.mxu1 %v1994_v3 }
 0x509   :  { %1345 = vmatpush.msrb.mxu2 %v1978_v59  ;;  %952 = vmatpush.msrb.mxu1 %v1998_v4 }
 0x50a   :  { %1307 = vmatmul.msk.f32.vlgmr.msra.gmra.mxu2 %vm186_vm1, %v1304_v24 }
 0x50b   :  { %1347 = vmatpush.msrb.mxu2 %v1982_v57  ;;  %953 = vmatpush.msrb.mxu1 %v2002_v6 }
 0x50d   :  { %1349 = vmatpush.msrb.mxu2 %v1986_v1 }
 0x50f   :  { %1351 = vmatpush.msrb.mxu2 %v1990_v2 }
 0x511   :  { %1353 = vmatpush.msrb.mxu2 %v1994_v3 }
 0x512   :  { %1308 = vmatmul.msk.f32.gmra.mxu2 %vm186_vm1, %v1305_v22 }
 0x513   :  { %1355 = vmatpush.msrb.mxu2 %v1998_v4 }
 0x515   :  { %1357 = vmatpush.msrb.mxu2 %v2002_v6 }
 0x517   :  { %990 = vmatpush.msra.mxu2 %v1326_v34 }
 0x519   :  { %991 = vmatpush.msra.mxu2 %v1325_v42 }
 0x51a   :  { %1309 = vmatmul.msk.f32.gmra.mxu2 %vm186_vm1, %v1306_v25 }
 0x51b   :  { %992 = vmatpush.msra.mxu2 %v1324_v43 }
 0x51d   :  { %993 = vmatpush.msra.mxu2 %v1323_v35 }
 0x522   :  { %1321 = vmatmul.msk.f32.vlgmr.msrb.gmra.mxu2 %vm186_vm1, %v1318_v9 }
 0x56f   :  { %v716_v31 = vpop.f32.mrf.mxu1 }
 0x570   :  { %1301 = vmatmul.msk.f32.vlgmr.msra.gmra.mxu1 %vm258_vm2, %v716_v31 }
 0x575   :  { %v759_v47 = vpop.f32.mrf.mxu2 }
 0x576   :  { %1298 = vmatmul.msk.f32.vlgmr.msrb.gmra.mxu3 %vm258_vm2, %v759_v47 }
 0x577   :  { %1342 = vmatpush.msrb.mxu3 %v1972_v27  ;;  %v719_v32 = vpop.f32.mrf.mxu1 }
 0x578   :  { %1302 = vmatmul.msk.f32.gmra.mxu1 %vm258_vm2, %v719_v32 }
 0x579   :  { %1344 = vmatpush.msrb.mxu3 %v1974_v33 }
 0x57b   :  { %1346 = vmatpush.msrb.mxu3 %v1978_v59 }
 0x57d   :  { %1348 = vmatpush.msrb.mxu3 %v1982_v57  ;;  %v762_v63 = vpop.f32.mrf.mxu2 }
 0x57e   :  { %1299 = vmatmul.msk.f32.gmra.mxu3 %vm258_vm2, %v762_v63 }
 0x57f   :  { %1350 = vmatpush.msrb.mxu3 %v1986_v1  ;;  %v722_v14 = vpop.f32.mrf.mxu1 }
 0x580   :  { %1303 = vmatmul.msk.f32.gmra.mxu1 %vm258_vm2, %v722_v14 }
 0x581   :  { %1352 = vmatpush.msrb.mxu3 %v1990_v2 }
 0x583   :  { %1354 = vmatpush.msrb.mxu3 %v1994_v3 }
 0x585   :  { %1356 = vmatpush.msrb.mxu3 %v1998_v4  ;;  %v765_v12 = vpop.f32.mrf.mxu2 }
 0x586   :  { %1300 = vmatmul.msk.f32.gmra.mxu3 %vm258_vm2, %v765_v12 }
 0x587   :  { %1358 = vmatpush.msrb.mxu3 %v2002_v6 }
 0x588   :  { %1320 = vmatmul.msk.f32.vlgmr.msrb.gmra.mxu1 %vm186_vm1, %v1317_v36  ;;  %v1168_v36 = vld [vmem:[%s2256_s15 + $0x18] sm:$0xff] }
 0x589   :  { %1194 = vmatpush.msra.mxu1 %v1168_v36 }
 0x58d   :  { %v873_v37 = vpop.f32.mrf.mxu2 }
 0x58e   :  { %1314 = vmatmul.msk.f32.vlgmr.msra.gmra.mxu3 %vm258_vm2, %v873_v37  ;;  %v1167_v37 = vld [vmem:[%s2256_s15 + $0x10] sm:$0xff] }
 0x58f   :  { %1195 = vmatpush.msra.mxu1 %v1167_v37 }
 0x595   :  { %v876_v38 = vpop.f32.mrf.mxu2 }
 0x596   :  { %1315 = vmatmul.msk.f32.gmra.mxu3 %vm258_vm2, %v876_v38  ;;  %v1166_v38 = vld [vmem:[%s2256_s15 + $0x8] sm:$0xff] }
 0x597   :  { %1196 = vmatpush.msra.mxu1 %v1166_v38 }
 0x59d   :  { %v879_v40 = vpop.f32.mrf.mxu2 }
 0x59e   :  { %1316 = vmatmul.msk.f32.gmra.mxu3 %vm258_vm2, %v879_v40  ;;  %v1165_v40 = vld [vmem:[%s2256_s15] sm:$0xff] }
 0x59f   :  { %1197 = vmatpush.msra.mxu1 %v1165_v40 }
 0x5a5   :  { %v958_v55 = vpop.f32.mrf.mxu2 }
 0x5a6   :  { %1322 = vmatmul.msk.f32.vlgmr.msrb.gmra.mxu3 %vm186_vm1, %v1319_v41  ;;  %vm1033_vm1 = vcmask 1041408  }
 0x5ed   :  { %v834_v49 = vpop.f32.mrf.mxu1 }
 0x5f5   :  { %v837_v44 = vpop.f32.mrf.mxu1 }
 0x5f9   :  { %v799_v45 = vpop.f32.mrf.mxu3 }
 0x5fa   :  { %v835_v46 = vadd.f32 %v834_v49, %v799_v45 }
 0x5fd   :  { %v840_v20 = vpop.f32.mrf.mxu1 }
 0x601   :  { %v802_v50 = vpop.f32.mrf.mxu3 }
 0x602   :  { %v838_v23 = vadd.f32 %v837_v44, %v802_v50 }
 0x605   :  { %v955_v51 = vpop.f32.mrf.mxu1 }
 0x606   :  { %1327 = vmatmul.msk.f32.vlgmr.msra.gmra.mxu2 %vm258_vm2, %v955_v51 }
 0x609   :  { %v805_v53 = vpop.f32.mrf.mxu3 }
 0x60a   :  { %v841_v54 = vadd.f32 %v840_v20, %v805_v53 }
 0x60e   :  { %1328 = vmatmul.msk.f32.gmra.mxu2 %vm258_vm2, %v958_v55 }
 0x611   :  { %v913_v19 = vpop.f32.mrf.mxu3 }
 0x612   :  { %v922_v27 = vadd.f32 %v913_v19, %v835_v46 }
 0x619   :  { %v916_v56 = vpop.f32.mrf.mxu3 }
 0x61a   :  { %v923_v33 = vadd.f32 %v916_v56, %v838_v23 }
 0x621   :  { %v919_v58 = vpop.f32.mrf.mxu3 }
 0x622   :  { %v924_v59 = vadd.f32 %v919_v58, %v841_v54 }
 0x629   :  { %v961_v60 = vpop.f32.mrf.mxu3 }
 0x62a   :  { %1329 = vmatmul.msk.f32.gmra.mxu2 %vm258_vm2, %v961_v60  ;;  %v1020_v60 = vld [vmem:[%s2258_s14] sm:$0xff] }
 0x689   :  { %v995_v57 = vpop.f32.mrf.mxu2 }
 0x68a   :  { %v1004_v3 = vadd.f32 %v995_v57, %v922_v27  ;;  %v1017_v27 = vld [vmem:[%s2257_s13] sm:$0xff] }
 0x68c   :  { %v1011_v61 = vadd.f32 %v1361_v18, %v1004_v3 }
 0x691   :  { %v998_v62 = vpop.f32.mrf.mxu2 }
 0x692   :  { %v1005_v2 = vadd.f32 %v998_v62, %v923_v33 }
 0x694   :  { %v1012_v6 = vadd.f32 %v1361_v18, %v1005_v2 }
 0x6ad   :  { %v1001_v1 = vpop.f32.mrf.mxu2 }
 0x6ae   :  { %v1006_v52 = vadd.f32 %v1001_v1, %v924_v59 }
 0x6b0   :  { %v1013_v4 = vadd.f32 %v1361_v18, %v1006_v52 }
 0x6b2   :  { %1330 = vmatpush.msk.msra.mxu3 %vm1033_vm1, %v1013_v4 }
 0x6b4   :  { %1051 = vmatpush.msra.mxu3 %v1012_v6 }
 0x6b6   :  { %1052 = vmatpush.msra.mxu3 %v1011_v61 }
 0x6b7   :  { %1331 = vmatmul.msk.f32.vlgmr.msra.gmra.mxu3 %vm1023_vm0, %v1014_v7 }
 0x6bf   :  { %1332 = vmatmul.msk.f32.gmra.mxu3 %vm1023_vm0, %v1015_v8 }
 0x6c7   :  { %1333 = vmatmul.msk.f32.gmra.mxu3 %vm1023_vm0, %v1016_v39 }
 0x73a   :  { %v1054_v10 = vpop.f32.mrf.mxu3 }
 0x73b   :  { %v1063_v30 = vsel %vm258_vm2, %v1054_v10, 0.0 }
 0x73c   :  { %1064 = vadd.xlane.f32.xlu2 %v1063_v30 }
 0x742   :  { %v1057_v0 = vpop.f32.mrf.mxu3 }
 0x743   :  { %v1066_v11 = vsel %vm258_vm2, %v1057_v0, 0.0 }
 0x744   :  { %1067 = vadd.xlane.f32.xlu1 %v1066_v11 }
 0x74a   :  { %v1060_v13 = vpop.f32.mrf.mxu3 }
 0x74b   :  { %v1070_v15 = vsel %vm1069_vm3, %v1060_v13, 0.0  ;;  %v1019_v13 = vld [vmem:[%s2257_s13 + $0x10] sm:$0x3] }
 0x74c   :  { %1071 = vadd.xlane.f32.xlu0 %v1070_v15 }
 0x7af   :  { %v1065_v28 = vpop.xlane.xlu2 %1064 }
 0x7b0   :  { %v1073_v24 = vmul.f32 0.0034722222, %v1065_v28 }
 0x7b2   :  { %v1076_v5 = vsub.f32 %v1011_v61, %v1073_v24  ;;  %v1362_v24 = vld [vmem:[%s2255_s16] ss:$0 sm:$0xff] }
 0x7b4   :  { %v1079_v9 = vmul.f32 %v1076_v5, %v1076_v5 }
 0x7b7   :  { %v1068_v21 = vpop.xlane.xlu1 %1067 }
 0x7b8   :  { %v1074_v48 = vmul.f32 0.0034722222, %v1068_v21  ;;  %v1022_v21 = vld [vmem:[%s2258_s14 + $0x10] sm:$0x3] }
 0x7ba   :  { %v2171_v25 = vsub.f32 %v1012_v6, %v1074_v48  ;;  %v1018_v6 = vld [vmem:[%s2257_s13 + $0x8] sm:$0xff] }
 0x7bc   :  { %v1080_v29 = vmul.f32 %v2171_v25, %v2171_v25 }
 0x7bf   :  { %v1072_v17 = vpop.xlane.xlu0 %1071 }
 0x7c0   :  { %v1075_v22 = vmul.f32 0.0034722222, %v1072_v17  ;;  %v24_v17 = vstv %s2260_s18 }
 0x7c1   :  { %25 = vst [vmem:[#allocation2] sm:$0x1] %v24_v17 }
 0x7c2   :  { %v2173_v26 = vsub.f32 %v1013_v4, %v1075_v22  ;;  %v1363_v22 = vld [vmem:[%s2259_s17] ss:$0 sm:$0xff] }
 0x7c4   :  { %v1081_v16 = vmul.f32 %v2173_v26, %v2173_v26 }
 0x7c6   :  { %1334 = vmatpush.msk.msra.mxu0 %vm1033_vm1, %v1081_v16 }
 0x7c8   :  { %1099 = vmatpush.msra.mxu0 %v1080_v29  ;;  %v1364_v36 = vld [vmem:[#allocation2] ss:$0 sm:$0xff] }
 0x7ca   :  { %1100 = vmatpush.msra.mxu0 %v1079_v9 }
 0x7cb   :  { %1335 = vmatmul.msk.f32.vlgmr.msra.gmra.mxu0 %vm1023_vm0, %v1014_v7 }
 0x7d3   :  { %1336 = vmatmul.msk.f32.gmra.mxu0 %vm1023_vm0, %v1015_v8  ;;  %v1021_v8 = vld [vmem:[%s2258_s14 + $0x8] sm:$0xff] }
 0x7db   :  { %1337 = vmatmul.msk.f32.gmra.mxu0 %vm1023_vm0, %v1016_v39 }
 0x848   :  { %v1102_v31 = vpop.f32.mrf.mxu0 }
 0x849   :  { %v1111_v47 = vsel %vm258_vm2, %v1102_v31, 0.0 }
 0x84a   :  { %1112 = vadd.xlane.f32.xlu0 %v1111_v47 }
 0x850   :  { %v1105_v32 = vpop.f32.mrf.mxu0 }
 0x851   :  { %v1114_v63 = vsel %vm258_vm2, %v1105_v32, 0.0 }
 0x852   :  { %1115 = vadd.xlane.f32.xlu1 %v1114_v63 }
 0x858   :  { %v1108_v14 = vpop.f32.mrf.mxu0 }
 0x859   :  { %v1117_v12 = vsel %vm1069_vm3, %v1108_v14, 0.0 }
 0x85a   :  { %1118 = vadd.xlane.f32.xlu2 %v1117_v12 }
 0x8bd   :  { %v1113_v41 = vpop.xlane.xlu0 %1112 }
 0x8be   :  { %v1120_v34 = vmul.f32 0.0034722222, %v1113_v41 }
 0x8c0   :  { %v1123_v42 = vadd.f32 1e-05, %v1120_v34 }
 0x8c2   :  { %1383 = vrsqrt.f32 %v1123_v42  ;;  %vm1132_vm5 = vweird.f32 %v1123_v42 }
 0x8c5   :  { %v1116_v43 = vpop.xlane.xlu1 %1115 }
 0x8c6   :  { %v1121_v35 = vmul.f32 0.0034722222, %v1116_v43 }
 0x8c8   :  { %v1384_v49 = vpop.eup %1383  ;;  %v1124_v44 = vadd.f32 1e-05, %v1121_v35 }
 0x8c9   :  { %v1127_v45 = vmul.f32 %v1384_v49, %v1123_v42  ;;  %vm1133_vm4 = vweird.f32 %v1384_v49 }
 0x8ca   :  { %1385 = vrsqrt.f32 %v1124_v44  ;;  %vm1134_vm6 = vmor %vm1132_vm5, %vm1133_vm4  ;;  %vm1142_vm8 = vweird.f32 %v1124_v44 }
 0x8cb   :  { %v1128_v46 = vmul.f32 %v1384_v49, %v1127_v45 }
 0x8cd   :  { %v1129_v20 = vmul.f32 0.5, %v1128_v46  ;;  %v1119_v50 = vpop.xlane.xlu2 %1118 }
 0x8ce   :  { %v1122_v23 = vmul.f32 0.0034722222, %v1119_v50 }
 0x8cf   :  { %v1130_v51 = vsub.f32 1.5, %v1129_v20 }
 0x8d0   :  { %v1386_v53 = vpop.eup %1385  ;;  %v1125_v54 = vadd.f32 1e-05, %v1122_v23 }
 0x8d1   :  { %v1131_v55 = vmul.f32 %v1384_v49, %v1130_v51  ;;  %v1137_v19 = vmul.f32 %v1386_v53, %v1124_v44  ;;  %vm1143_vm7 = vweird.f32 %v1386_v53 }
 0x8d2   :  { %1387 = vrsqrt.f32 %v1125_v54  ;;  %vm1144_vm9 = vmor %vm1142_vm8, %vm1143_vm7  ;;  %vm1152_vm11 = vweird.f32 %v1125_v54 }
 0x8d3   :  { %v1135_v56 = vsel %vm1134_vm6, %v1384_v49, %v1131_v55  ;;  %v1138_v33 = vmul.f32 %v1386_v53, %v1137_v19 }
 0x8d4   :  { %v1156_v58 = vmul.f32 %v1135_v56, %v1076_v5 }
 0x8d5   :  { %v1139_v59 = vmul.f32 0.5, %v1138_v33 }
 0x8d6   :  { %v1159_v57 = vmul.f32 %v1156_v58, %v1017_v27 }
 0x8d7   :  { %v1140_v62 = vsub.f32 1.5, %v1139_v59 }
 0x8d8   :  { %v1388_v1 = vpop.eup %1387  ;;  %v1162_v18 = vadd.f32 %v1159_v57, %v1020_v60 }
 0x8d9   :  { %v1141_v2 = vmul.f32 %v1386_v53, %v1140_v62  ;;  %v1147_v52 = vmul.f32 %v1388_v1, %v1125_v54  ;;  %vm1153_vm10 = vweird.f32 %v1388_v1 }
 0x8da   :  { %1338 = vmatmul.msk.f32.vlgmr.msra.gmra.mxu1 %vm258_vm2, %v1162_v18  ;;  %vm1154_vm12 = vmor %vm1152_vm11, %vm1153_vm10 }
 0x8db   :  { %v1145_v3 = vsel %vm1144_vm9, %v1386_v53, %v1141_v2  ;;  %v1148_v4 = vmul.f32 %v1388_v1, %v1147_v52 }
 0x8dc   :  { %v1157_v61 = vmul.f32 %v1145_v3, %v2171_v25 }
 0x8dd   :  { %v1149_v7 = vmul.f32 0.5, %v1148_v4 }
 0x8de   :  { %v1160_v39 = vmul.f32 %v1157_v61, %v1018_v6 }
 0x8df   :  { %v1150_v10 = vsub.f32 1.5, %v1149_v7 }
 0x8e0   :  { %v1163_v30 = vadd.f32 %v1160_v39, %v1021_v8 }
 0x8e1   :  { %v1151_v0 = vmul.f32 %v1388_v1, %v1150_v10 }
 0x8e2   :  { %1339 = vmatmul.msk.f32.gmra.mxu1 %vm258_vm2, %v1163_v30 }
 0x8e3   :  { %v1155_v11 = vsel %vm1154_vm12, %v1388_v1, %v1151_v0 }
 0x8e4   :  { %v1158_v15 = vmul.f32 %v1155_v11, %v2173_v26 }
 0x8e6   :  { %v1161_v28 = vmul.f32 %v1158_v15, %v1019_v13 }
 0x8e8   :  { %v1164_v48 = vadd.f32 %v1161_v28, %v1022_v21 }
 0x8ea   :  { %1340 = vmatmul.msk.f32.gmra.mxu1 %vm258_vm2, %v1164_v48 }
 0x957   :  { %v1199_v25 = vpop.f32.mrf.mxu1 }
 0x958   :  { %v1200_v26 = vadd.f32 %v1362_v24, %v1199_v25 }
 0x95a   :  { %v1212_v5 = vmul.f32 %v1363_v22, %v1200_v26 }
 0x95c   :  { %v1215_v16 = vsel %vm258_vm2, %v1212_v5, 0.0 }
 0x95d   :  { %1216 = vadd.xlane.f32.xlu0 %v1215_v16 }
 0x95f   :  { %v1202_v29 = vpop.f32.mrf.mxu1 }
 0x960   :  { %v1203_v9 = vadd.f32 %v1362_v24, %v1202_v29 }
 0x962   :  { %v1213_v31 = vmul.f32 %v1363_v22, %v1203_v9 }
 0x964   :  { %v1218_v47 = vsel %vm258_vm2, %v1213_v31, 0.0  ;;  %vm1234_vm2 = vcmask 1024  }
 0x965   :  { %1219 = vadd.xlane.f32.xlu1 %v1218_v47 }
 0x967   :  { %v1205_v32 = vpop.f32.mrf.mxu1 }
 0x968   :  { %v1206_v63 = vadd.f32 %v1362_v24, %v1205_v32 }
 0x96a   :  { %v1214_v14 = vmul.f32 %v1363_v22, %v1206_v63 }
 0x96c   :  { %v1221_v12 = vsel %vm1069_vm3, %v1214_v14, 0.0 }
 0x96d   :  { %1222 = vadd.xlane.f32.xlu2 %v1221_v12 }
 0x9d0   :  { %v1217_v37 = vpop.xlane.xlu0 %1216 }
 0x9d1   :  { %v1228_v38 = vadd.f32 %v1364_v36, %v1217_v37 }
 0x9d3   :  { %1232 = vst.msk [vmem:[%s2261_s19] sm:$0xff] %vm1231_vm13, %v1228_v38 }
 0x9d8   :  { %v1220_v40 = vpop.xlane.xlu1 %1219 }
 0x9d9   :  { %v1229_v41 = vadd.f32 %v1364_v36, %v1220_v40 }
 0x9db   :  { %1233 = vst.msk [vmem:[%s2261_s19 + $0x8] sm:$0xff] %vm1231_vm13, %v1229_v41 }
 0x9e0   :  { %v1223_v34 = vpop.xlane.xlu2 %1222 }
 0x9e1   :  { %v1230_v42 = vadd.f32 %v1364_v36, %v1223_v34 }
 0x9e3   :  { %1235 = vst.msk [vmem:[%s2261_s19 + $0x10] sm:$0x3] %vm1234_vm2, %v1230_v42 }

</bundles_post_ra>
